<compile_context>
chip_gen: v6e
topology: v6e:2x2x1
jax: 0.10.0
libtpu: 0.0.40
codegen_flags: <defaults>
</compile_context>

<pallas_src>
import jax
import jax.numpy as jnp
from jax.experimental import pallas as pl
from jax.experimental.pallas import tpu as pltpu


# ----------------------------- Fused model kernel ----------------------------
def _make_fused_kernel(n_rnn, T, B_pad):
    """Kernel closure over static layer count / time extent / padded batch.

    Ref layout (inputs, output, scratch — in pallas_call order):
      refs[0]                      x        (T*B_pad, D_in)  time-major, padded
      refs[1 : 1+3*n_rnn]          per RNN layer: W_ih^T (D,H), W_hh^T (H,H), b (1,H)
      refs[1+3n], refs[2+3n]       lin_w^T (H, D_in), lin_b (1, D_in)
      refs[3+3n]                   out      (T*B_pad, D_in)
      refs[4+3n], refs[5+3n]       z_scr, a_scr   VMEM (T*B_pad, H) scratch
    Assumes a uniform hidden size across layers.
    """

    def kernel(*refs):
        x_ref = refs[0]
        rnn_refs = refs[1:1 + 3 * n_rnn]
        lin_w_ref = refs[1 + 3 * n_rnn]
        lin_b_ref = refs[2 + 3 * n_rnn]
        out_ref = refs[3 + 3 * n_rnn]
        z_scr = refs[4 + 3 * n_rnn]      # hoisted input projection, all steps
        a_scr = refs[5 + 3 * n_rnn]      # current layer's output hidden states

        for layer in range(n_rnn):
            w_ih = rnn_refs[3 * layer][...]       # (D, H)  pre-transposed
            w_hh = rnn_refs[3 * layer + 1][...]   # (H, H)  pre-transposed
            b = rnn_refs[3 * layer + 2][...]      # (1, H)  = b_ih + b_hh
            H = w_ih.shape[1]

            # Layer input: original x for layer 0, previous layer's hidden
            # states (already VMEM-resident) afterwards.  Load happens before
            # a_scr is overwritten below (ref program order preserved).
            x_in = x_ref[...] if layer == 0 else a_scr[...]

            # Time-independent input projection for ALL steps in one matmul,
            # bias folded in (hoisted out of the recurrence).
            z_scr[...] = (
                jnp.dot(x_in, w_ih, preferred_element_type=jnp.float32) + b
            )

            # Sequential recurrence, fully unrolled (T static and small).
            # All slices are sublane-aligned because B_pad % 8 == 0.
            h = jnp.zeros((B_pad, H), jnp.float32)    # h0 = 0 (PyTorch default)
            for t in range(T):
                r = t * B_pad
                h = jnp.tanh(
                    z_scr[r:r + B_pad, :]
                    + jnp.dot(h, w_hh, preferred_element_type=jnp.float32)
                )
                a_scr[r:r + B_pad, :] = h

        # Fused final Linear over the whole VMEM-resident activation slab;
        # single writeback of the full output.
        y = (
            jnp.dot(a_scr[...], lin_w_ref[...], preferred_element_type=jnp.float32)
            + lin_b_ref[...]
        )
        out_ref[...] = y.astype(out_ref.dtype)

    return kernel


# ------------------------------ Forward wrapper -------------------------------
@jax.jit
def rnn_autoencoder_forward(x_btd, params):
    """x_btd: (B, T, input_dim) -> (B, T, input_dim)."""
    rnn_layers = params["rnn_layers"]
    n_rnn = len(rnn_layers)
    B, T, D_in = x_btd.shape
    H = rnn_layers[0][0].shape[1]
    B_pad = ((B + 7) // 8) * 8          # sublane-align the batch

    # Time-major, zero-padded batch, flattened: row index = t*B_pad + b.
    x_tbd = jnp.transpose(x_btd, (1, 0, 2)).astype(jnp.float32)      # (T, B, D)
    x_tbd = jnp.pad(x_tbd, ((0, 0), (0, B_pad - B), (0, 0)))         # (T, Bp, D)
    x_tb = x_tbd.reshape(T * B_pad, D_in)

    flat = [x_tb]
    for (w_ih_t, w_hh_t, b) in rnn_layers:
        flat += [w_ih_t, w_hh_t, b]
    flat += [params["lin_w_t"], params["lin_b"]]

    # Full-array blocks (trivial grid) — everything resident in VMEM.
    in_specs = [pl.BlockSpec(a.shape, lambda i: (0, 0)) for a in flat]

    y = pl.pallas_call(
        _make_fused_kernel(n_rnn, T, B_pad),
        out_shape=jax.ShapeDtypeStruct((T * B_pad, D_in), jnp.float32),
        grid_spec=pltpu.PrefetchScalarGridSpec(
            num_scalar_prefetch=0,
            grid=(1,),
            in_specs=in_specs,
            out_specs=pl.BlockSpec((T * B_pad, D_in), lambda i: (0, 0)),
            scratch_shapes=[
                pltpu.VMEM((T * B_pad, H), jnp.float32),   # z_scr
                pltpu.VMEM((T * B_pad, H), jnp.float32),   # a_scr
            ],
        ),
        compiler_params=pltpu.CompilerParams(
            dimension_semantics=("arbitrary",)),
    )(*flat)

    y = y.reshape(T, B_pad, D_in)[:, :B, :]        # drop padded batch rows
    return jnp.transpose(y, (1, 0, 2))


# --------------------------- Parameter construction --------------------------
def init_params(key, input_dim, hidden_dim, num_layers):
    """Mirrors RNNAutoencoder.__init__ for the default (mirror=False,
    progressive=False) path with integer hidden_dim:
      encoder: num_layers RNNs,  decoder: num_layers RNNs + Linear(H, input_dim).
    Weights stored pre-transposed for the kernel; RNN biases pre-summed."""
    hidden_dims = [hidden_dim] * (num_layers * 2)

    rnn_dims = []
    prev = input_dim
    for i in range(num_layers):                 # encoder
        rnn_dims.append((prev, hidden_dims[i]))
        prev = hidden_dims[i]
    for i in range(num_layers):                 # decoder RNNs
        rnn_dims.append((prev, hidden_dims[num_layers + i]))
        prev = hidden_dims[num_layers + i]

    rnn_layers = []
    for (d, h) in rnn_dims:
        key, k1, k2, k3, k4 = jax.random.split(key, 5)
        bound = 1.0 / jnp.sqrt(h)
        w_ih = jax.random.uniform(k1, (h, d), jnp.float32, -bound, bound)
        w_hh = jax.random.uniform(k2, (h, h), jnp.float32, -bound, bound)
        b_ih = jax.random.uniform(k3, (h,), jnp.float32, -bound, bound)
        b_hh = jax.random.uniform(k4, (h,), jnp.float32, -bound, bound)
        rnn_layers.append((w_ih.T, w_hh.T, (b_ih + b_hh).reshape(1, h)))

    key, k1, k2 = jax.random.split(key, 3)
    bound = 1.0 / jnp.sqrt(prev)
    lin_w = jax.random.uniform(k1, (input_dim, prev), jnp.float32, -bound, bound)
    lin_b = jax.random.uniform(k2, (input_dim,), jnp.float32, -bound, bound)
    return {"rnn_layers": rnn_layers,
            "lin_w_t": lin_w.T,
            "lin_b": lin_b.reshape(1, input_dim)}


# ------------------------------ Pure-JAX reference ----------------------------
def _reference_forward(x_btd, params):
    x = jnp.transpose(x_btd, (1, 0, 2)).astype(jnp.float32)    # (T, B, D)
    for (w_ih_t, w_hh_t, b) in params["rnn_layers"]:
        H = w_ih_t.shape[1]
        B = x.shape[1]

        def step(h, x_t, w_ih_t=w_ih_t, w_hh_t=w_hh_t, b=b):
            h_new = jnp.tanh(x_t @ w_ih_t + h @ w_hh_t + b)
            return h_new, h_new

        _, x = jax.lax.scan(step, jnp.zeros((B, H), jnp.float32), x)
    y = x @ params["lin_w_t"] + params["lin_b"]
    return jnp.transpose(y, (1, 0, 2))


if __name__ == "__main__":
    # Shapes consistent with the module: RNNAutoencoder(input_dim=8,
    # hidden_dim=32, num_layers=2, seq_len=8); input x: (batch=2, seq=8, 8).
    B, T, INPUT_DIM, HIDDEN_DIM, NUM_LAYERS = 2, 8, 8, 32, 2

    key = jax.random.PRNGKey(0)
    key, pkey, xkey = jax.random.split(key, 3)
    params = init_params(pkey, INPUT_DIM, HIDDEN_DIM, NUM_LAYERS)
    x = jax.random.normal(xkey, (B, T, INPUT_DIM), jnp.float32)

    out = rnn_autoencoder_forward(x, params)
    out = jax.block_until_ready(out)

    ref = _reference_forward(x, params)
    assert out.shape == (B, T, INPUT_DIM), out.shape
    assert jnp.allclose(out, ref, atol=1e-5, rtol=1e-5), \
        float(jnp.max(jnp.abs(out - ref)))

    print("KERNEL_OK")
</pallas_src>

<mosaic_0001>
module attributes {stable_mosaic.version = 11 : i64} {
  func.func @kernel(%arg0: i32, %arg1: memref<64x8xf32, #tpu.memory_space<vmem>>, %arg2: memref<8x32xf32, #tpu.memory_space<vmem>>, %arg3: memref<32x32xf32, #tpu.memory_space<vmem>>, %arg4: memref<1x32xf32, #tpu.memory_space<vmem>>, %arg5: memref<32x32xf32, #tpu.memory_space<vmem>>, %arg6: memref<32x32xf32, #tpu.memory_space<vmem>>, %arg7: memref<1x32xf32, #tpu.memory_space<vmem>>, %arg8: memref<32x32xf32, #tpu.memory_space<vmem>>, %arg9: memref<32x32xf32, #tpu.memory_space<vmem>>, %arg10: memref<1x32xf32, #tpu.memory_space<vmem>>, %arg11: memref<32x32xf32, #tpu.memory_space<vmem>>, %arg12: memref<32x32xf32, #tpu.memory_space<vmem>>, %arg13: memref<1x32xf32, #tpu.memory_space<vmem>>, %arg14: memref<32x8xf32, #tpu.memory_space<vmem>>, %arg15: memref<1x8xf32, #tpu.memory_space<vmem>>, %arg16: memref<64x8xf32, #tpu.memory_space<vmem>>, %arg17: memref<64x32xf32, #tpu.memory_space<vmem>>, %arg18: memref<64x32xf32, #tpu.memory_space<vmem>>) attributes {dimension_semantics = [#tpu.dimension_semantics<arbitrary>], iteration_bounds = array<i64: 1>, scalar_prefetch = 0 : i64, scratch_operands = 2 : i64, tpu.core_type = #tpu.core_type<tc>, window_params = [{pipeline_mode = #tpu.pipeline_mode<synchronous>, transform_indices = @transform_0, window_bounds = array<i64: 64, 8>}, {pipeline_mode = #tpu.pipeline_mode<synchronous>, transform_indices = @transform_1, window_bounds = array<i64: 8, 32>}, {pipeline_mode = #tpu.pipeline_mode<synchronous>, transform_indices = @transform_2, window_bounds = array<i64: 32, 32>}, {pipeline_mode = #tpu.pipeline_mode<synchronous>, transform_indices = @transform_3, window_bounds = array<i64: 1, 32>}, {pipeline_mode = #tpu.pipeline_mode<synchronous>, transform_indices = @transform_4, window_bounds = array<i64: 32, 32>}, {pipeline_mode = #tpu.pipeline_mode<synchronous>, transform_indices = @transform_5, window_bounds = array<i64: 32, 32>}, {pipeline_mode = #tpu.pipeline_mode<synchronous>, transform_indices = @transform_6, window_bounds = array<i64: 1, 32>}, {pipeline_mode = #tpu.pipeline_mode<synchronous>, transform_indices = @transform_7, window_bounds = array<i64: 32, 32>}, {pipeline_mode = #tpu.pipeline_mode<synchronous>, transform_indices = @transform_8, window_bounds = array<i64: 32, 32>}, {pipeline_mode = #tpu.pipeline_mode<synchronous>, transform_indices = @transform_9, window_bounds = array<i64: 1, 32>}, {pipeline_mode = #tpu.pipeline_mode<synchronous>, transform_indices = @transform_10, window_bounds = array<i64: 32, 32>}, {pipeline_mode = #tpu.pipeline_mode<synchronous>, transform_indices = @transform_11, window_bounds = array<i64: 32, 32>}, {pipeline_mode = #tpu.pipeline_mode<synchronous>, transform_indices = @transform_12, window_bounds = array<i64: 1, 32>}, {pipeline_mode = #tpu.pipeline_mode<synchronous>, transform_indices = @transform_13, window_bounds = array<i64: 32, 8>}, {pipeline_mode = #tpu.pipeline_mode<synchronous>, transform_indices = @transform_14, window_bounds = array<i64: 1, 8>}, {pipeline_mode = #tpu.pipeline_mode<synchronous>, transform_indices = @transform_15, window_bounds = array<i64: 64, 8>}]} {
    %c0 = arith.constant 0 : index
    %c0_0 = arith.constant 0 : index
    %0 = vector.load %arg2[%c0, %c0_0] : memref<8x32xf32, #tpu.memory_space<vmem>>, vector<8x32xf32>
    %c0_1 = arith.constant 0 : index
    %c0_2 = arith.constant 0 : index
    %1 = vector.load %arg3[%c0_1, %c0_2] : memref<32x32xf32, #tpu.memory_space<vmem>>, vector<32x32xf32>
    %c0_3 = arith.constant 0 : index
    %c0_4 = arith.constant 0 : index
    %2 = vector.load %arg4[%c0_3, %c0_4] : memref<1x32xf32, #tpu.memory_space<vmem>>, vector<1x32xf32>
    %c0_5 = arith.constant 0 : index
    %c0_6 = arith.constant 0 : index
    %3 = vector.load %arg1[%c0_5, %c0_6] : memref<64x8xf32, #tpu.memory_space<vmem>>, vector<64x8xf32>
    %cst = arith.constant dense<0.000000e+00> : vector<64x32xf32>
    %4 = tpu.matmul %3, %0, %cst {dimension_numbers = #tpu.dot_dimension_numbers<[1], [0], [0], [1], [0, 0, 1, 1], [], []>} : vector<64x8xf32>, vector<8x32xf32>, vector<64x32xf32> -> vector<64x32xf32>
    %5 = vector.broadcast %2 : vector<1x32xf32> to vector<64x32xf32>
    %6 = arith.addf %4, %5 : vector<64x32xf32>
    %c0_7 = arith.constant 0 : index
    %c0_8 = arith.constant 0 : index
    %7 = vector.load %arg17[%c0_7, %c0_8] : memref<64x32xf32, #tpu.memory_space<vmem>>, vector<64x32xf32>
    tpu.vector_store %arg17[%c0_7, %c0_8], %6 {strides = array<i32>} : memref<64x32xf32, #tpu.memory_space<vmem>>, vector<64x32xf32>,
    %cst_9 = arith.constant 0.000000e+00 : f32
    %8 = vector.broadcast %cst_9 : f32 to vector<8x32xf32>
    %c0_10 = arith.constant 0 : index
    %c0_11 = arith.constant 0 : index
    %9 = vector.load %arg17[%c0_10, %c0_11] : memref<64x32xf32, #tpu.memory_space<vmem>>, vector<8x32xf32>
    %cst_12 = arith.constant dense<0.000000e+00> : vector<8x32xf32>
    %10 = tpu.matmul %8, %1, %cst_12 {dimension_numbers = #tpu.dot_dimension_numbers<[1], [0], [0], [1], [0, 0, 1, 1], [], []>} : vector<8x32xf32>, vector<32x32xf32>, vector<8x32xf32> -> vector<8x32xf32>
    %11 = arith.addf %9, %10 : vector<8x32xf32>
    %12 = math.tanh %11 : vector<8x32xf32>
    %c0_13 = arith.constant 0 : index
    %c0_14 = arith.constant 0 : index
    %13 = vector.load %arg18[%c0_13, %c0_14] : memref<64x32xf32, #tpu.memory_space<vmem>>, vector<8x32xf32>
    tpu.vector_store %arg18[%c0_13, %c0_14], %12 {strides = array<i32>} : memref<64x32xf32, #tpu.memory_space<vmem>>, vector<8x32xf32>,
    %c8 = arith.constant 8 : index
    %c0_15 = arith.constant 0 : index
    %14 = vector.load %arg17[%c8, %c0_15] : memref<64x32xf32, #tpu.memory_space<vmem>>, vector<8x32xf32>
    %cst_16 = arith.constant dense<0.000000e+00> : vector<8x32xf32>
    %15 = tpu.matmul %12, %1, %cst_16 {dimension_numbers = #tpu.dot_dimension_numbers<[1], [0], [0], [1], [0, 0, 1, 1], [], []>} : vector<8x32xf32>, vector<32x32xf32>, vector<8x32xf32> -> vector<8x32xf32>
    %16 = arith.addf %14, %15 : vector<8x32xf32>
    %17 = math.tanh %16 : vector<8x32xf32>
    %c8_17 = arith.constant 8 : index
    %c0_18 = arith.constant 0 : index
    %18 = vector.load %arg18[%c8_17, %c0_18] : memref<64x32xf32, #tpu.memory_space<vmem>>, vector<8x32xf32>
    tpu.vector_store %arg18[%c8_17, %c0_18], %17 {strides = array<i32>} : memref<64x32xf32, #tpu.memory_space<vmem>>, vector<8x32xf32>,
    %c16 = arith.constant 16 : index
    %c0_19 = arith.constant 0 : index
    %19 = vector.load %arg17[%c16, %c0_19] : memref<64x32xf32, #tpu.memory_space<vmem>>, vector<8x32xf32>
    %cst_20 = arith.constant dense<0.000000e+00> : vector<8x32xf32>
    %20 = tpu.matmul %17, %1, %cst_20 {dimension_numbers = #tpu.dot_dimension_numbers<[1], [0], [0], [1], [0, 0, 1, 1], [], []>} : vector<8x32xf32>, vector<32x32xf32>, vector<8x32xf32> -> vector<8x32xf32>
    %21 = arith.addf %19, %20 : vector<8x32xf32>
    %22 = math.tanh %21 : vector<8x32xf32>
    %c16_21 = arith.constant 16 : index
    %c0_22 = arith.constant 0 : index
    %23 = vector.load %arg18[%c16_21, %c0_22] : memref<64x32xf32, #tpu.memory_space<vmem>>, vector<8x32xf32>
    tpu.vector_store %arg18[%c16_21, %c0_22], %22 {strides = array<i32>} : memref<64x32xf32, #tpu.memory_space<vmem>>, vector<8x32xf32>,
    %c24 = arith.constant 24 : index
    %c0_23 = arith.constant 0 : index
    %24 = vector.load %arg17[%c24, %c0_23] : memref<64x32xf32, #tpu.memory_space<vmem>>, vector<8x32xf32>
    %cst_24 = arith.constant dense<0.000000e+00> : vector<8x32xf32>
    %25 = tpu.matmul %22, %1, %cst_24 {dimension_numbers = #tpu.dot_dimension_numbers<[1], [0], [0], [1], [0, 0, 1, 1], [], []>} : vector<8x32xf32>, vector<32x32xf32>, vector<8x32xf32> -> vector<8x32xf32>
    %26 = arith.addf %24, %25 : vector<8x32xf32>
    %27 = math.tanh %26 : vector<8x32xf32>
    %c24_25 = arith.constant 24 : index
    %c0_26 = arith.constant 0 : index
    %28 = vector.load %arg18[%c24_25, %c0_26] : memref<64x32xf32, #tpu.memory_space<vmem>>, vector<8x32xf32>
    tpu.vector_store %arg18[%c24_25, %c0_26], %27 {strides = array<i32>} : memref<64x32xf32, #tpu.memory_space<vmem>>, vector<8x32xf32>,
    %c32 = arith.constant 32 : index
    %c0_27 = arith.constant 0 : index
    %29 = vector.load %arg17[%c32, %c0_27] : memref<64x32xf32, #tpu.memory_space<vmem>>, vector<8x32xf32>
    %cst_28 = arith.constant dense<0.000000e+00> : vector<8x32xf32>
    %30 = tpu.matmul %27, %1, %cst_28 {dimension_numbers = #tpu.dot_dimension_numbers<[1], [0], [0], [1], [0, 0, 1, 1], [], []>} : vector<8x32xf32>, vector<32x32xf32>, vector<8x32xf32> -> vector<8x32xf32>
    %31 = arith.addf %29, %30 : vector<8x32xf32>
    %32 = math.tanh %31 : vector<8x32xf32>
    %c32_29 = arith.constant 32 : index
    %c0_30 = arith.constant 0 : index
    %33 = vector.load %arg18[%c32_29, %c0_30] : memref<64x32xf32, #tpu.memory_space<vmem>>, vector<8x32xf32>
    tpu.vector_store %arg18[%c32_29, %c0_30], %32 {strides = array<i32>} : memref<64x32xf32, #tpu.memory_space<vmem>>, vector<8x32xf32>,
    %c40 = arith.constant 40 : index
    %c0_31 = arith.constant 0 : index
    %34 = vector.load %arg17[%c40, %c0_31] : memref<64x32xf32, #tpu.memory_space<vmem>>, vector<8x32xf32>
    %cst_32 = arith.constant dense<0.000000e+00> : vector<8x32xf32>
    %35 = tpu.matmul %32, %1, %cst_32 {dimension_numbers = #tpu.dot_dimension_numbers<[1], [0], [0], [1], [0, 0, 1, 1], [], []>} : vector<8x32xf32>, vector<32x32xf32>, vector<8x32xf32> -> vector<8x32xf32>
    %36 = arith.addf %34, %35 : vector<8x32xf32>
    %37 = math.tanh %36 : vector<8x32xf32>
    %c40_33 = arith.constant 40 : index
    %c0_34 = arith.constant 0 : index
    %38 = vector.load %arg18[%c40_33, %c0_34] : memref<64x32xf32, #tpu.memory_space<vmem>>, vector<8x32xf32>
    tpu.vector_store %arg18[%c40_33, %c0_34], %37 {strides = array<i32>} : memref<64x32xf32, #tpu.memory_space<vmem>>, vector<8x32xf32>,
    %c48 = arith.constant 48 : index
    %c0_35 = arith.constant 0 : index
    %39 = vector.load %arg17[%c48, %c0_35] : memref<64x32xf32, #tpu.memory_space<vmem>>, vector<8x32xf32>
    %cst_36 = arith.constant dense<0.000000e+00> : vector<8x32xf32>
    %40 = tpu.matmul %37, %1, %cst_36 {dimension_numbers = #tpu.dot_dimension_numbers<[1], [0], [0], [1], [0, 0, 1, 1], [], []>} : vector<8x32xf32>, vector<32x32xf32>, vector<8x32xf32> -> vector<8x32xf32>
    %41 = arith.addf %39, %40 : vector<8x32xf32>
    %42 = math.tanh %41 : vector<8x32xf32>
    %c48_37 = arith.constant 48 : index
    %c0_38 = arith.constant 0 : index
    %43 = vector.load %arg18[%c48_37, %c0_38] : memref<64x32xf32, #tpu.memory_space<vmem>>, vector<8x32xf32>
    tpu.vector_store %arg18[%c48_37, %c0_38], %42 {strides = array<i32>} : memref<64x32xf32, #tpu.memory_space<vmem>>, vector<8x32xf32>,
    %c56 = arith.constant 56 : index
    %c0_39 = arith.constant 0 : index
    %44 = vector.load %arg17[%c56, %c0_39] : memref<64x32xf32, #tpu.memory_space<vmem>>, vector<8x32xf32>
    %cst_40 = arith.constant dense<0.000000e+00> : vector<8x32xf32>
    %45 = tpu.matmul %42, %1, %cst_40 {dimension_numbers = #tpu.dot_dimension_numbers<[1], [0], [0], [1], [0, 0, 1, 1], [], []>} : vector<8x32xf32>, vector<32x32xf32>, vector<8x32xf32> -> vector<8x32xf32>
    %46 = arith.addf %44, %45 : vector<8x32xf32>
    %47 = math.tanh %46 : vector<8x32xf32>
    %c56_41 = arith.constant 56 : index
    %c0_42 = arith.constant 0 : index
    %48 = vector.load %arg18[%c56_41, %c0_42] : memref<64x32xf32, #tpu.memory_space<vmem>>, vector<8x32xf32>
    tpu.vector_store %arg18[%c56_41, %c0_42], %47 {strides = array<i32>} : memref<64x32xf32, #tpu.memory_space<vmem>>, vector<8x32xf32>,
    %c0_43 = arith.constant 0 : index
    %c0_44 = arith.constant 0 : index
    %49 = vector.load %arg5[%c0_43, %c0_44] : memref<32x32xf32, #tpu.memory_space<vmem>>, vector<32x32xf32>
    %c0_45 = arith.constant 0 : index
    %c0_46 = arith.constant 0 : index
    %50 = vector.load %arg6[%c0_45, %c0_46] : memref<32x32xf32, #tpu.memory_space<vmem>>, vector<32x32xf32>
    %c0_47 = arith.constant 0 : index
    %c0_48 = arith.constant 0 : index
    %51 = vector.load %arg7[%c0_47, %c0_48] : memref<1x32xf32, #tpu.memory_space<vmem>>, vector<1x32xf32>
    %c0_49 = arith.constant 0 : index
    %c0_50 = arith.constant 0 : index
    %52 = vector.load %arg18[%c0_49, %c0_50] : memref<64x32xf32, #tpu.memory_space<vmem>>, vector<64x32xf32>
    %cst_51 = arith.constant dense<0.000000e+00> : vector<64x32xf32>
    %53 = tpu.matmul %52, %49, %cst_51 {dimension_numbers = #tpu.dot_dimension_numbers<[1], [0], [0], [1], [0, 0, 1, 1], [], []>} : vector<64x32xf32>, vector<32x32xf32>, vector<64x32xf32> -> vector<64x32xf32>
    %54 = vector.broadcast %51 : vector<1x32xf32> to vector<64x32xf32>
    %55 = arith.addf %53, %54 : vector<64x32xf32>
    %c0_52 = arith.constant 0 : index
    %c0_53 = arith.constant 0 : index
    %56 = vector.load %arg17[%c0_52, %c0_53] : memref<64x32xf32, #tpu.memory_space<vmem>>, vector<64x32xf32>
    tpu.vector_store %arg17[%c0_52, %c0_53], %55 {strides = array<i32>} : memref<64x32xf32, #tpu.memory_space<vmem>>, vector<64x32xf32>,
    %cst_54 = arith.constant 0.000000e+00 : f32
    %57 = vector.broadcast %cst_54 : f32 to vector<8x32xf32>
    %c0_55 = arith.constant 0 : index
    %c0_56 = arith.constant 0 : index
    %58 = vector.load %arg17[%c0_55, %c0_56] : memref<64x32xf32, #tpu.memory_space<vmem>>, vector<8x32xf32>
    %cst_57 = arith.constant dense<0.000000e+00> : vector<8x32xf32>
    %59 = tpu.matmul %57, %50, %cst_57 {dimension_numbers = #tpu.dot_dimension_numbers<[1], [0], [0], [1], [0, 0, 1, 1], [], []>} : vector<8x32xf32>, vector<32x32xf32>, vector<8x32xf32> -> vector<8x32xf32>
    %60 = arith.addf %58, %59 : vector<8x32xf32>
    %61 = math.tanh %60 : vector<8x32xf32>
    %c0_58 = arith.constant 0 : index
    %c0_59 = arith.constant 0 : index
    %62 = vector.load %arg18[%c0_58, %c0_59] : memref<64x32xf32, #tpu.memory_space<vmem>>, vector<8x32xf32>
    tpu.vector_store %arg18[%c0_58, %c0_59], %61 {strides = array<i32>} : memref<64x32xf32, #tpu.memory_space<vmem>>, vector<8x32xf32>,
    %c8_60 = arith.constant 8 : index
    %c0_61 = arith.constant 0 : index
    %63 = vector.load %arg17[%c8_60, %c0_61] : memref<64x32xf32, #tpu.memory_space<vmem>>, vector<8x32xf32>
    %cst_62 = arith.constant dense<0.000000e+00> : vector<8x32xf32>
    %64 = tpu.matmul %61, %50, %cst_62 {dimension_numbers = #tpu.dot_dimension_numbers<[1], [0], [0], [1], [0, 0, 1, 1], [], []>} : vector<8x32xf32>, vector<32x32xf32>, vector<8x32xf32> -> vector<8x32xf32>
    %65 = arith.addf %63, %64 : vector<8x32xf32>
    %66 = math.tanh %65 : vector<8x32xf32>
    %c8_63 = arith.constant 8 : index
    %c0_64 = arith.constant 0 : index
    %67 = vector.load %arg18[%c8_63, %c0_64] : memref<64x32xf32, #tpu.memory_space<vmem>>, vector<8x32xf32>
    tpu.vector_store %arg18[%c8_63, %c0_64], %66 {strides = array<i32>} : memref<64x32xf32, #tpu.memory_space<vmem>>, vector<8x32xf32>,
    %c16_65 = arith.constant 16 : index
    %c0_66 = arith.constant 0 : index
    %68 = vector.load %arg17[%c16_65, %c0_66] : memref<64x32xf32, #tpu.memory_space<vmem>>, vector<8x32xf32>
    %cst_67 = arith.constant dense<0.000000e+00> : vector<8x32xf32>
    %69 = tpu.matmul %66, %50, %cst_67 {dimension_numbers = #tpu.dot_dimension_numbers<[1], [0], [0], [1], [0, 0, 1, 1], [], []>} : vector<8x32xf32>, vector<32x32xf32>, vector<8x32xf32> -> vector<8x32xf32>
    %70 = arith.addf %68, %69 : vector<8x32xf32>
    %71 = math.tanh %70 : vector<8x32xf32>
    %c16_68 = arith.constant 16 : index
    %c0_69 = arith.constant 0 : index
    %72 = vector.load %arg18[%c16_68, %c0_69] : memref<64x32xf32, #tpu.memory_space<vmem>>, vector<8x32xf32>
    tpu.vector_store %arg18[%c16_68, %c0_69], %71 {strides = array<i32>} : memref<64x32xf32, #tpu.memory_space<vmem>>, vector<8x32xf32>,
    %c24_70 = arith.constant 24 : index
    %c0_71 = arith.constant 0 : index
    %73 = vector.load %arg17[%c24_70, %c0_71] : memref<64x32xf32, #tpu.memory_space<vmem>>, vector<8x32xf32>
    %cst_72 = arith.constant dense<0.000000e+00> : vector<8x32xf32>
    %74 = tpu.matmul %71, %50, %cst_72 {dimension_numbers = #tpu.dot_dimension_numbers<[1], [0], [0], [1], [0, 0, 1, 1], [], []>} : vector<8x32xf32>, vector<32x32xf32>, vector<8x32xf32> -> vector<8x32xf32>
    %75 = arith.addf %73, %74 : vector<8x32xf32>
    %76 = math.tanh %75 : vector<8x32xf32>
    %c24_73 = arith.constant 24 : index
    %c0_74 = arith.constant 0 : index
    %77 = vector.load %arg18[%c24_73, %c0_74] : memref<64x32xf32, #tpu.memory_space<vmem>>, vector<8x32xf32>
    tpu.vector_store %arg18[%c24_73, %c0_74], %76 {strides = array<i32>} : memref<64x32xf32, #tpu.memory_space<vmem>>, vector<8x32xf32>,
    %c32_75 = arith.constant 32 : index
    %c0_76 = arith.constant 0 : index
    %78 = vector.load %arg17[%c32_75, %c0_76] : memref<64x32xf32, #tpu.memory_space<vmem>>, vector<8x32xf32>
    %cst_77 = arith.constant dense<0.000000e+00> : vector<8x32xf32>
    %79 = tpu.matmul %76, %50, %cst_77 {dimension_numbers = #tpu.dot_dimension_numbers<[1], [0], [0], [1], [0, 0, 1, 1], [], []>} : vector<8x32xf32>, vector<32x32xf32>, vector<8x32xf32> -> vector<8x32xf32>
    %80 = arith.addf %78, %79 : vector<8x32xf32>
    %81 = math.tanh %80 : vector<8x32xf32>
    %c32_78 = arith.constant 32 : index
    %c0_79 = arith.constant 0 : index
    %82 = vector.load %arg18[%c32_78, %c0_79] : memref<64x32xf32, #tpu.memory_space<vmem>>, vector<8x32xf32>
    tpu.vector_store %arg18[%c32_78, %c0_79], %81 {strides = array<i32>} : memref<64x32xf32, #tpu.memory_space<vmem>>, vector<8x32xf32>,
    %c40_80 = arith.constant 40 : index
    %c0_81 = arith.constant 0 : index
    %83 = vector.load %arg17[%c40_80, %c0_81] : memref<64x32xf32, #tpu.memory_space<vmem>>, vector<8x32xf32>
    %cst_82 = arith.constant dense<0.000000e+00> : vector<8x32xf32>
    %84 = tpu.matmul %81, %50, %cst_82 {dimension_numbers = #tpu.dot_dimension_numbers<[1], [0], [0], [1], [0, 0, 1, 1], [], []>} : vector<8x32xf32>, vector<32x32xf32>, vector<8x32xf32> -> vector<8x32xf32>
    %85 = arith.addf %83, %84 : vector<8x32xf32>
    %86 = math.tanh %85 : vector<8x32xf32>
    %c40_83 = arith.constant 40 : index
    %c0_84 = arith.constant 0 : index
    %87 = vector.load %arg18[%c40_83, %c0_84] : memref<64x32xf32, #tpu.memory_space<vmem>>, vector<8x32xf32>
    tpu.vector_store %arg18[%c40_83, %c0_84], %86 {strides = array<i32>} : memref<64x32xf32, #tpu.memory_space<vmem>>, vector<8x32xf32>,
    %c48_85 = arith.constant 48 : index
    %c0_86 = arith.constant 0 : index
    %88 = vector.load %arg17[%c48_85, %c0_86] : memref<64x32xf32, #tpu.memory_space<vmem>>, vector<8x32xf32>
    %cst_87 = arith.constant dense<0.000000e+00> : vector<8x32xf32>
    %89 = tpu.matmul %86, %50, %cst_87 {dimension_numbers = #tpu.dot_dimension_numbers<[1], [0], [0], [1], [0, 0, 1, 1], [], []>} : vector<8x32xf32>, vector<32x32xf32>, vector<8x32xf32> -> vector<8x32xf32>
    %90 = arith.addf %88, %89 : vector<8x32xf32>
    %91 = math.tanh %90 : vector<8x32xf32>
    %c48_88 = arith.constant 48 : index
    %c0_89 = arith.constant 0 : index
    %92 = vector.load %arg18[%c48_88, %c0_89] : memref<64x32xf32, #tpu.memory_space<vmem>>, vector<8x32xf32>
    tpu.vector_store %arg18[%c48_88, %c0_89], %91 {strides = array<i32>} : memref<64x32xf32, #tpu.memory_space<vmem>>, vector<8x32xf32>,
    %c56_90 = arith.constant 56 : index
    %c0_91 = arith.constant 0 : index
    %93 = vector.load %arg17[%c56_90, %c0_91] : memref<64x32xf32, #tpu.memory_space<vmem>>, vector<8x32xf32>
    %cst_92 = arith.constant dense<0.000000e+00> : vector<8x32xf32>
    %94 = tpu.matmul %91, %50, %cst_92 {dimension_numbers = #tpu.dot_dimension_numbers<[1], [0], [0], [1], [0, 0, 1, 1], [], []>} : vector<8x32xf32>, vector<32x32xf32>, vector<8x32xf32> -> vector<8x32xf32>
    %95 = arith.addf %93, %94 : vector<8x32xf32>
    %96 = math.tanh %95 : vector<8x32xf32>
    %c56_93 = arith.constant 56 : index
    %c0_94 = arith.constant 0 : index
    %97 = vector.load %arg18[%c56_93, %c0_94] : memref<64x32xf32, #tpu.memory_space<vmem>>, vector<8x32xf32>
    tpu.vector_store %arg18[%c56_93, %c0_94], %96 {strides = array<i32>} : memref<64x32xf32, #tpu.memory_space<vmem>>, vector<8x32xf32>,
    %c0_95 = arith.constant 0 : index
    %c0_96 = arith.constant 0 : index
    %98 = vector.load %arg8[%c0_95, %c0_96] : memref<32x32xf32, #tpu.memory_space<vmem>>, vector<32x32xf32>
    %c0_97 = arith.constant 0 : index
    %c0_98 = arith.constant 0 : index
    %99 = vector.load %arg9[%c0_97, %c0_98] : memref<32x32xf32, #tpu.memory_space<vmem>>, vector<32x32xf32>
    %c0_99 = arith.constant 0 : index
    %c0_100 = arith.constant 0 : index
    %100 = vector.load %arg10[%c0_99, %c0_100] : memref<1x32xf32, #tpu.memory_space<vmem>>, vector<1x32xf32>
    %c0_101 = arith.constant 0 : index
    %c0_102 = arith.constant 0 : index
    %101 = vector.load %arg18[%c0_101, %c0_102] : memref<64x32xf32, #tpu.memory_space<vmem>>, vector<64x32xf32>
    %cst_103 = arith.constant dense<0.000000e+00> : vector<64x32xf32>
    %102 = tpu.matmul %101, %98, %cst_103 {dimension_numbers = #tpu.dot_dimension_numbers<[1], [0], [0], [1], [0, 0, 1, 1], [], []>} : vector<64x32xf32>, vector<32x32xf32>, vector<64x32xf32> -> vector<64x32xf32>
    %103 = vector.broadcast %100 : vector<1x32xf32> to vector<64x32xf32>
    %104 = arith.addf %102, %103 : vector<64x32xf32>
    %c0_104 = arith.constant 0 : index
    %c0_105 = arith.constant 0 : index
    %105 = vector.load %arg17[%c0_104, %c0_105] : memref<64x32xf32, #tpu.memory_space<vmem>>, vector<64x32xf32>
    tpu.vector_store %arg17[%c0_104, %c0_105], %104 {strides = array<i32>} : memref<64x32xf32, #tpu.memory_space<vmem>>, vector<64x32xf32>,
    %cst_106 = arith.constant 0.000000e+00 : f32
    %106 = vector.broadcast %cst_106 : f32 to vector<8x32xf32>
    %c0_107 = arith.constant 0 : index
    %c0_108 = arith.constant 0 : index
    %107 = vector.load %arg17[%c0_107, %c0_108] : memref<64x32xf32, #tpu.memory_space<vmem>>, vector<8x32xf32>
    %cst_109 = arith.constant dense<0.000000e+00> : vector<8x32xf32>
    %108 = tpu.matmul %106, %99, %cst_109 {dimension_numbers = #tpu.dot_dimension_numbers<[1], [0], [0], [1], [0, 0, 1, 1], [], []>} : vector<8x32xf32>, vector<32x32xf32>, vector<8x32xf32> -> vector<8x32xf32>
    %109 = arith.addf %107, %108 : vector<8x32xf32>
    %110 = math.tanh %109 : vector<8x32xf32>
    %c0_110 = arith.constant 0 : index
    %c0_111 = arith.constant 0 : index
    %111 = vector.load %arg18[%c0_110, %c0_111] : memref<64x32xf32, #tpu.memory_space<vmem>>, vector<8x32xf32>
    tpu.vector_store %arg18[%c0_110, %c0_111], %110 {strides = array<i32>} : memref<64x32xf32, #tpu.memory_space<vmem>>, vector<8x32xf32>,
    %c8_112 = arith.constant 8 : index
    %c0_113 = arith.constant 0 : index
    %112 = vector.load %arg17[%c8_112, %c0_113] : memref<64x32xf32, #tpu.memory_space<vmem>>, vector<8x32xf32>
    %cst_114 = arith.constant dense<0.000000e+00> : vector<8x32xf32>
    %113 = tpu.matmul %110, %99, %cst_114 {dimension_numbers = #tpu.dot_dimension_numbers<[1], [0], [0], [1], [0, 0, 1, 1], [], []>} : vector<8x32xf32>, vector<32x32xf32>, vector<8x32xf32> -> vector<8x32xf32>
    %114 = arith.addf %112, %113 : vector<8x32xf32>
    %115 = math.tanh %114 : vector<8x32xf32>
    %c8_115 = arith.constant 8 : index
    %c0_116 = arith.constant 0 : index
    %116 = vector.load %arg18[%c8_115, %c0_116] : memref<64x32xf32, #tpu.memory_space<vmem>>, vector<8x32xf32>
    tpu.vector_store %arg18[%c8_115, %c0_116], %115 {strides = array<i32>} : memref<64x32xf32, #tpu.memory_space<vmem>>, vector<8x32xf32>,
    %c16_117 = arith.constant 16 : index
    %c0_118 = arith.constant 0 : index
    %117 = vector.load %arg17[%c16_117, %c0_118] : memref<64x32xf32, #tpu.memory_space<vmem>>, vector<8x32xf32>
    %cst_119 = arith.constant dense<0.000000e+00> : vector<8x32xf32>
    %118 = tpu.matmul %115, %99, %cst_119 {dimension_numbers = #tpu.dot_dimension_numbers<[1], [0], [0], [1], [0, 0, 1, 1], [], []>} : vector<8x32xf32>, vector<32x32xf32>, vector<8x32xf32> -> vector<8x32xf32>
    %119 = arith.addf %117, %118 : vector<8x32xf32>
    %120 = math.tanh %119 : vector<8x32xf32>
    %c16_120 = arith.constant 16 : index
    %c0_121 = arith.constant 0 : index
    %121 = vector.load %arg18[%c16_120, %c0_121] : memref<64x32xf32, #tpu.memory_space<vmem>>, vector<8x32xf32>
    tpu.vector_store %arg18[%c16_120, %c0_121], %120 {strides = array<i32>} : memref<64x32xf32, #tpu.memory_space<vmem>>, vector<8x32xf32>,
    %c24_122 = arith.constant 24 : index
    %c0_123 = arith.constant 0 : index
    %122 = vector.load %arg17[%c24_122, %c0_123] : memref<64x32xf32, #tpu.memory_space<vmem>>, vector<8x32xf32>
    %cst_124 = arith.constant dense<0.000000e+00> : vector<8x32xf32>
    %123 = tpu.matmul %120, %99, %cst_124 {dimension_numbers = #tpu.dot_dimension_numbers<[1], [0], [0], [1], [0, 0, 1, 1], [], []>} : vector<8x32xf32>, vector<32x32xf32>, vector<8x32xf32> -> vector<8x32xf32>
    %124 = arith.addf %122, %123 : vector<8x32xf32>
    %125 = math.tanh %124 : vector<8x32xf32>
    %c24_125 = arith.constant 24 : index
    %c0_126 = arith.constant 0 : index
    %126 = vector.load %arg18[%c24_125, %c0_126] : memref<64x32xf32, #tpu.memory_space<vmem>>, vector<8x32xf32>
    tpu.vector_store %arg18[%c24_125, %c0_126], %125 {strides = array<i32>} : memref<64x32xf32, #tpu.memory_space<vmem>>, vector<8x32xf32>,
    %c32_127 = arith.constant 32 : index
    %c0_128 = arith.constant 0 : index
    %127 = vector.load %arg17[%c32_127, %c0_128] : memref<64x32xf32, #tpu.memory_space<vmem>>, vector<8x32xf32>
    %cst_129 = arith.constant dense<0.000000e+00> : vector<8x32xf32>
    %128 = tpu.matmul %125, %99, %cst_129 {dimension_numbers = #tpu.dot_dimension_numbers<[1], [0], [0], [1], [0, 0, 1, 1], [], []>} : vector<8x32xf32>, vector<32x32xf32>, vector<8x32xf32> -> vector<8x32xf32>
    %129 = arith.addf %127, %128 : vector<8x32xf32>
    %130 = math.tanh %129 : vector<8x32xf32>
    %c32_130 = arith.constant 32 : index
    %c0_131 = arith.constant 0 : index
    %131 = vector.load %arg18[%c32_130, %c0_131] : memref<64x32xf32, #tpu.memory_space<vmem>>, vector<8x32xf32>
    tpu.vector_store %arg18[%c32_130, %c0_131], %130 {strides = array<i32>} : memref<64x32xf32, #tpu.memory_space<vmem>>, vector<8x32xf32>,
    %c40_132 = arith.constant 40 : index
    %c0_133 = arith.constant 0 : index
    %132 = vector.load %arg17[%c40_132, %c0_133] : memref<64x32xf32, #tpu.memory_space<vmem>>, vector<8x32xf32>
    %cst_134 = arith.constant dense<0.000000e+00> : vector<8x32xf32>
    %133 = tpu.matmul %130, %99, %cst_134 {dimension_numbers = #tpu.dot_dimension_numbers<[1], [0], [0], [1], [0, 0, 1, 1], [], []>} : vector<8x32xf32>, vector<32x32xf32>, vector<8x32xf32> -> vector<8x32xf32>
    %134 = arith.addf %132, %133 : vector<8x32xf32>
    %135 = math.tanh %134 : vector<8x32xf32>
    %c40_135 = arith.constant 40 : index
    %c0_136 = arith.constant 0 : index
    %136 = vector.load %arg18[%c40_135, %c0_136] : memref<64x32xf32, #tpu.memory_space<vmem>>, vector<8x32xf32>
    tpu.vector_store %arg18[%c40_135, %c0_136], %135 {strides = array<i32>} : memref<64x32xf32, #tpu.memory_space<vmem>>, vector<8x32xf32>,
    %c48_137 = arith.constant 48 : index
    %c0_138 = arith.constant 0 : index
    %137 = vector.load %arg17[%c48_137, %c0_138] : memref<64x32xf32, #tpu.memory_space<vmem>>, vector<8x32xf32>
    %cst_139 = arith.constant dense<0.000000e+00> : vector<8x32xf32>
    %138 = tpu.matmul %135, %99, %cst_139 {dimension_numbers = #tpu.dot_dimension_numbers<[1], [0], [0], [1], [0, 0, 1, 1], [], []>} : vector<8x32xf32>, vector<32x32xf32>, vector<8x32xf32> -> vector<8x32xf32>
    %139 = arith.addf %137, %138 : vector<8x32xf32>
    %140 = math.tanh %139 : vector<8x32xf32>
    %c48_140 = arith.constant 48 : index
    %c0_141 = arith.constant 0 : index
    %141 = vector.load %arg18[%c48_140, %c0_141] : memref<64x32xf32, #tpu.memory_space<vmem>>, vector<8x32xf32>
    tpu.vector_store %arg18[%c48_140, %c0_141], %140 {strides = array<i32>} : memref<64x32xf32, #tpu.memory_space<vmem>>, vector<8x32xf32>,
    %c56_142 = arith.constant 56 : index
    %c0_143 = arith.constant 0 : index
    %142 = vector.load %arg17[%c56_142, %c0_143] : memref<64x32xf32, #tpu.memory_space<vmem>>, vector<8x32xf32>
    %cst_144 = arith.constant dense<0.000000e+00> : vector<8x32xf32>
    %143 = tpu.matmul %140, %99, %cst_144 {dimension_numbers = #tpu.dot_dimension_numbers<[1], [0], [0], [1], [0, 0, 1, 1], [], []>} : vector<8x32xf32>, vector<32x32xf32>, vector<8x32xf32> -> vector<8x32xf32>
    %144 = arith.addf %142, %143 : vector<8x32xf32>
    %145 = math.tanh %144 : vector<8x32xf32>
    %c56_145 = arith.constant 56 : index
    %c0_146 = arith.constant 0 : index
    %146 = vector.load %arg18[%c56_145, %c0_146] : memref<64x32xf32, #tpu.memory_space<vmem>>, vector<8x32xf32>
    tpu.vector_store %arg18[%c56_145, %c0_146], %145 {strides = array<i32>} : memref<64x32xf32, #tpu.memory_space<vmem>>, vector<8x32xf32>,
    %c0_147 = arith.constant 0 : index
    %c0_148 = arith.constant 0 : index
    %147 = vector.load %arg11[%c0_147, %c0_148] : memref<32x32xf32, #tpu.memory_space<vmem>>, vector<32x32xf32>
    %c0_149 = arith.constant 0 : index
    %c0_150 = arith.constant 0 : index
    %148 = vector.load %arg12[%c0_149, %c0_150] : memref<32x32xf32, #tpu.memory_space<vmem>>, vector<32x32xf32>
    %c0_151 = arith.constant 0 : index
    %c0_152 = arith.constant 0 : index
    %149 = vector.load %arg13[%c0_151, %c0_152] : memref<1x32xf32, #tpu.memory_space<vmem>>, vector<1x32xf32>
    %c0_153 = arith.constant 0 : index
    %c0_154 = arith.constant 0 : index
    %150 = vector.load %arg18[%c0_153, %c0_154] : memref<64x32xf32, #tpu.memory_space<vmem>>, vector<64x32xf32>
    %cst_155 = arith.constant dense<0.000000e+00> : vector<64x32xf32>
    %151 = tpu.matmul %150, %147, %cst_155 {dimension_numbers = #tpu.dot_dimension_numbers<[1], [0], [0], [1], [0, 0, 1, 1], [], []>} : vector<64x32xf32>, vector<32x32xf32>, vector<64x32xf32> -> vector<64x32xf32>
    %152 = vector.broadcast %149 : vector<1x32xf32> to vector<64x32xf32>
    %153 = arith.addf %151, %152 : vector<64x32xf32>
    %c0_156 = arith.constant 0 : index
    %c0_157 = arith.constant 0 : index
    %154 = vector.load %arg17[%c0_156, %c0_157] : memref<64x32xf32, #tpu.memory_space<vmem>>, vector<64x32xf32>
    tpu.vector_store %arg17[%c0_156, %c0_157], %153 {strides = array<i32>} : memref<64x32xf32, #tpu.memory_space<vmem>>, vector<64x32xf32>,
    %cst_158 = arith.constant 0.000000e+00 : f32
    %155 = vector.broadcast %cst_158 : f32 to vector<8x32xf32>
    %c0_159 = arith.constant 0 : index
    %c0_160 = arith.constant 0 : index
    %156 = vector.load %arg17[%c0_159, %c0_160] : memref<64x32xf32, #tpu.memory_space<vmem>>, vector<8x32xf32>
    %cst_161 = arith.constant dense<0.000000e+00> : vector<8x32xf32>
    %157 = tpu.matmul %155, %148, %cst_161 {dimension_numbers = #tpu.dot_dimension_numbers<[1], [0], [0], [1], [0, 0, 1, 1], [], []>} : vector<8x32xf32>, vector<32x32xf32>, vector<8x32xf32> -> vector<8x32xf32>
    %158 = arith.addf %156, %157 : vector<8x32xf32>
    %159 = math.tanh %158 : vector<8x32xf32>
    %c0_162 = arith.constant 0 : index
    %c0_163 = arith.constant 0 : index
    %160 = vector.load %arg18[%c0_162, %c0_163] : memref<64x32xf32, #tpu.memory_space<vmem>>, vector<8x32xf32>
    tpu.vector_store %arg18[%c0_162, %c0_163], %159 {strides = array<i32>} : memref<64x32xf32, #tpu.memory_space<vmem>>, vector<8x32xf32>,
    %c8_164 = arith.constant 8 : index
    %c0_165 = arith.constant 0 : index
    %161 = vector.load %arg17[%c8_164, %c0_165] : memref<64x32xf32, #tpu.memory_space<vmem>>, vector<8x32xf32>
    %cst_166 = arith.constant dense<0.000000e+00> : vector<8x32xf32>
    %162 = tpu.matmul %159, %148, %cst_166 {dimension_numbers = #tpu.dot_dimension_numbers<[1], [0], [0], [1], [0, 0, 1, 1], [], []>} : vector<8x32xf32>, vector<32x32xf32>, vector<8x32xf32> -> vector<8x32xf32>
    %163 = arith.addf %161, %162 : vector<8x32xf32>
    %164 = math.tanh %163 : vector<8x32xf32>
    %c8_167 = arith.constant 8 : index
    %c0_168 = arith.constant 0 : index
    %165 = vector.load %arg18[%c8_167, %c0_168] : memref<64x32xf32, #tpu.memory_space<vmem>>, vector<8x32xf32>
    tpu.vector_store %arg18[%c8_167, %c0_168], %164 {strides = array<i32>} : memref<64x32xf32, #tpu.memory_space<vmem>>, vector<8x32xf32>,
    %c16_169 = arith.constant 16 : index
    %c0_170 = arith.constant 0 : index
    %166 = vector.load %arg17[%c16_169, %c0_170] : memref<64x32xf32, #tpu.memory_space<vmem>>, vector<8x32xf32>
    %cst_171 = arith.constant dense<0.000000e+00> : vector<8x32xf32>
    %167 = tpu.matmul %164, %148, %cst_171 {dimension_numbers = #tpu.dot_dimension_numbers<[1], [0], [0], [1], [0, 0, 1, 1], [], []>} : vector<8x32xf32>, vector<32x32xf32>, vector<8x32xf32> -> vector<8x32xf32>
    %168 = arith.addf %166, %167 : vector<8x32xf32>
    %169 = math.tanh %168 : vector<8x32xf32>
    %c16_172 = arith.constant 16 : index
    %c0_173 = arith.constant 0 : index
    %170 = vector.load %arg18[%c16_172, %c0_173] : memref<64x32xf32, #tpu.memory_space<vmem>>, vector<8x32xf32>
    tpu.vector_store %arg18[%c16_172, %c0_173], %169 {strides = array<i32>} : memref<64x32xf32, #tpu.memory_space<vmem>>, vector<8x32xf32>,
    %c24_174 = arith.constant 24 : index
    %c0_175 = arith.constant 0 : index
    %171 = vector.load %arg17[%c24_174, %c0_175] : memref<64x32xf32, #tpu.memory_space<vmem>>, vector<8x32xf32>
    %cst_176 = arith.constant dense<0.000000e+00> : vector<8x32xf32>
    %172 = tpu.matmul %169, %148, %cst_176 {dimension_numbers = #tpu.dot_dimension_numbers<[1], [0], [0], [1], [0, 0, 1, 1], [], []>} : vector<8x32xf32>, vector<32x32xf32>, vector<8x32xf32> -> vector<8x32xf32>
    %173 = arith.addf %171, %172 : vector<8x32xf32>
    %174 = math.tanh %173 : vector<8x32xf32>
    %c24_177 = arith.constant 24 : index
    %c0_178 = arith.constant 0 : index
    %175 = vector.load %arg18[%c24_177, %c0_178] : memref<64x32xf32, #tpu.memory_space<vmem>>, vector<8x32xf32>
    tpu.vector_store %arg18[%c24_177, %c0_178], %174 {strides = array<i32>} : memref<64x32xf32, #tpu.memory_space<vmem>>, vector<8x32xf32>,
    %c32_179 = arith.constant 32 : index
    %c0_180 = arith.constant 0 : index
    %176 = vector.load %arg17[%c32_179, %c0_180] : memref<64x32xf32, #tpu.memory_space<vmem>>, vector<8x32xf32>
    %cst_181 = arith.constant dense<0.000000e+00> : vector<8x32xf32>
    %177 = tpu.matmul %174, %148, %cst_181 {dimension_numbers = #tpu.dot_dimension_numbers<[1], [0], [0], [1], [0, 0, 1, 1], [], []>} : vector<8x32xf32>, vector<32x32xf32>, vector<8x32xf32> -> vector<8x32xf32>
    %178 = arith.addf %176, %177 : vector<8x32xf32>
    %179 = math.tanh %178 : vector<8x32xf32>
    %c32_182 = arith.constant 32 : index
    %c0_183 = arith.constant 0 : index
    %180 = vector.load %arg18[%c32_182, %c0_183] : memref<64x32xf32, #tpu.memory_space<vmem>>, vector<8x32xf32>
    tpu.vector_store %arg18[%c32_182, %c0_183], %179 {strides = array<i32>} : memref<64x32xf32, #tpu.memory_space<vmem>>, vector<8x32xf32>,
    %c40_184 = arith.constant 40 : index
    %c0_185 = arith.constant 0 : index
    %181 = vector.load %arg17[%c40_184, %c0_185] : memref<64x32xf32, #tpu.memory_space<vmem>>, vector<8x32xf32>
    %cst_186 = arith.constant dense<0.000000e+00> : vector<8x32xf32>
    %182 = tpu.matmul %179, %148, %cst_186 {dimension_numbers = #tpu.dot_dimension_numbers<[1], [0], [0], [1], [0, 0, 1, 1], [], []>} : vector<8x32xf32>, vector<32x32xf32>, vector<8x32xf32> -> vector<8x32xf32>
    %183 = arith.addf %181, %182 : vector<8x32xf32>
    %184 = math.tanh %183 : vector<8x32xf32>
    %c40_187 = arith.constant 40 : index
    %c0_188 = arith.constant 0 : index
    %185 = vector.load %arg18[%c40_187, %c0_188] : memref<64x32xf32, #tpu.memory_space<vmem>>, vector<8x32xf32>
    tpu.vector_store %arg18[%c40_187, %c0_188], %184 {strides = array<i32>} : memref<64x32xf32, #tpu.memory_space<vmem>>, vector<8x32xf32>,
    %c48_189 = arith.constant 48 : index
    %c0_190 = arith.constant 0 : index
    %186 = vector.load %arg17[%c48_189, %c0_190] : memref<64x32xf32, #tpu.memory_space<vmem>>, vector<8x32xf32>
    %cst_191 = arith.constant dense<0.000000e+00> : vector<8x32xf32>
    %187 = tpu.matmul %184, %148, %cst_191 {dimension_numbers = #tpu.dot_dimension_numbers<[1], [0], [0], [1], [0, 0, 1, 1], [], []>} : vector<8x32xf32>, vector<32x32xf32>, vector<8x32xf32> -> vector<8x32xf32>
    %188 = arith.addf %186, %187 : vector<8x32xf32>
    %189 = math.tanh %188 : vector<8x32xf32>
    %c48_192 = arith.constant 48 : index
    %c0_193 = arith.constant 0 : index
    %190 = vector.load %arg18[%c48_192, %c0_193] : memref<64x32xf32, #tpu.memory_space<vmem>>, vector<8x32xf32>
    tpu.vector_store %arg18[%c48_192, %c0_193], %189 {strides = array<i32>} : memref<64x32xf32, #tpu.memory_space<vmem>>, vector<8x32xf32>,
    %c56_194 = arith.constant 56 : index
    %c0_195 = arith.constant 0 : index
    %191 = vector.load %arg17[%c56_194, %c0_195] : memref<64x32xf32, #tpu.memory_space<vmem>>, vector<8x32xf32>
    %cst_196 = arith.constant dense<0.000000e+00> : vector<8x32xf32>
    %192 = tpu.matmul %189, %148, %cst_196 {dimension_numbers = #tpu.dot_dimension_numbers<[1], [0], [0], [1], [0, 0, 1, 1], [], []>} : vector<8x32xf32>, vector<32x32xf32>, vector<8x32xf32> -> vector<8x32xf32>
    %193 = arith.addf %191, %192 : vector<8x32xf32>
    %194 = math.tanh %193 : vector<8x32xf32>
    %c56_197 = arith.constant 56 : index
    %c0_198 = arith.constant 0 : index
    %195 = vector.load %arg18[%c56_197, %c0_198] : memref<64x32xf32, #tpu.memory_space<vmem>>, vector<8x32xf32>
    tpu.vector_store %arg18[%c56_197, %c0_198], %194 {strides = array<i32>} : memref<64x32xf32, #tpu.memory_space<vmem>>, vector<8x32xf32>,
    %c0_199 = arith.constant 0 : index
    %c0_200 = arith.constant 0 : index
    %196 = vector.load %arg18[%c0_199, %c0_200] : memref<64x32xf32, #tpu.memory_space<vmem>>, vector<64x32xf32>
    %c0_201 = arith.constant 0 : index
    %c0_202 = arith.constant 0 : index
    %197 = vector.load %arg14[%c0_201, %c0_202] : memref<32x8xf32, #tpu.memory_space<vmem>>, vector<32x8xf32>
    %cst_203 = arith.constant dense<0.000000e+00> : vector<64x8xf32>
    %198 = tpu.matmul %196, %197, %cst_203 {dimension_numbers = #tpu.dot_dimension_numbers<[1], [0], [0], [1], [0, 0, 1, 1], [], []>} : vector<64x32xf32>, vector<32x8xf32>, vector<64x8xf32> -> vector<64x8xf32>
    %c0_204 = arith.constant 0 : index
    %c0_205 = arith.constant 0 : index
    %199 = vector.load %arg15[%c0_204, %c0_205] : memref<1x8xf32, #tpu.memory_space<vmem>>, vector<1x8xf32>
    %200 = vector.broadcast %199 : vector<1x8xf32> to vector<64x8xf32>
    %201 = arith.addf %198, %200 : vector<64x8xf32>
    %c0_206 = arith.constant 0 : index
    %c0_207 = arith.constant 0 : index
    %202 = vector.load %arg16[%c0_206, %c0_207] : memref<64x8xf32, #tpu.memory_space<vmem>>, vector<64x8xf32>
    tpu.vector_store %arg16[%c0_206, %c0_207], %201 {strides = array<i32>} : memref<64x8xf32, #tpu.memory_space<vmem>>, vector<64x8xf32>,
    return
  }
  func.func @transform_0(%arg0: i32) -> (i32, i32) {
    %c0_i32 = arith.constant 0 : i32
    %c0_i32_0 = arith.constant 0 : i32
    %c0_i32_1 = arith.constant 0 : i32
    return %c0_i32, %c0_i32_0 : i32, i32
  }
  func.func @transform_1(%arg0: i32) -> (i32, i32) {
    %c0_i32 = arith.constant 0 : i32
    %c0_i32_0 = arith.constant 0 : i32
    %c0_i32_1 = arith.constant 0 : i32
    return %c0_i32, %c0_i32_0 : i32, i32
  }
  func.func @transform_2(%arg0: i32) -> (i32, i32) {
    %c0_i32 = arith.constant 0 : i32
    %c0_i32_0 = arith.constant 0 : i32
    %c0_i32_1 = arith.constant 0 : i32
    return %c0_i32, %c0_i32_0 : i32, i32
  }
  func.func @transform_3(%arg0: i32) -> (i32, i32) {
    %c0_i32 = arith.constant 0 : i32
    %c0_i32_0 = arith.constant 0 : i32
    %c0_i32_1 = arith.constant 0 : i32
    return %c0_i32, %c0_i32_0 : i32, i32
  }
  func.func @transform_4(%arg0: i32) -> (i32, i32) {
    %c0_i32 = arith.constant 0 : i32
    %c0_i32_0 = arith.constant 0 : i32
    %c0_i32_1 = arith.constant 0 : i32
    return %c0_i32, %c0_i32_0 : i32, i32
  }
  func.func @transform_5(%arg0: i32) -> (i32, i32) {
    %c0_i32 = arith.constant 0 : i32
    %c0_i32_0 = arith.constant 0 : i32
    %c0_i32_1 = arith.constant 0 : i32
    return %c0_i32, %c0_i32_0 : i32, i32
  }
  func.func @transform_6(%arg0: i32) -> (i32, i32) {
    %c0_i32 = arith.constant 0 : i32
    %c0_i32_0 = arith.constant 0 : i32
    %c0_i32_1 = arith.constant 0 : i32
    return %c0_i32, %c0_i32_0 : i32, i32
  }
  func.func @transform_7(%arg0: i32) -> (i32, i32) {
    %c0_i32 = arith.constant 0 : i32
    %c0_i32_0 = arith.constant 0 : i32
    %c0_i32_1 = arith.constant 0 : i32
    return %c0_i32, %c0_i32_0 : i32, i32
  }
  func.func @transform_8(%arg0: i32) -> (i32, i32) {
    %c0_i32 = arith.constant 0 : i32
    %c0_i32_0 = arith.constant 0 : i32
    %c0_i32_1 = arith.constant 0 : i32
    return %c0_i32, %c0_i32_0 : i32, i32
  }
  func.func @transform_9(%arg0: i32) -> (i32, i32) {
    %c0_i32 = arith.constant 0 : i32
    %c0_i32_0 = arith.constant 0 : i32
    %c0_i32_1 = arith.constant 0 : i32
    return %c0_i32, %c0_i32_0 : i32, i32
  }
  func.func @transform_10(%arg0: i32) -> (i32, i32) {
    %c0_i32 = arith.constant 0 : i32
    %c0_i32_0 = arith.constant 0 : i32
    %c0_i32_1 = arith.constant 0 : i32
    return %c0_i32, %c0_i32_0 : i32, i32
  }
  func.func @transform_11(%arg0: i32) -> (i32, i32) {
    %c0_i32 = arith.constant 0 : i32
    %c0_i32_0 = arith.constant 0 : i32
    %c0_i32_1 = arith.constant 0 : i32
    return %c0_i32, %c0_i32_0 : i32, i32
  }
  func.func @transform_12(%arg0: i32) -> (i32, i32) {
    %c0_i32 = arith.constant 0 : i32
    %c0_i32_0 = arith.constant 0 : i32
    %c0_i32_1 = arith.constant 0 : i32
    return %c0_i32, %c0_i32_0 : i32, i32
  }
  func.func @transform_13(%arg0: i32) -> (i32, i32) {
    %c0_i32 = arith.constant 0 : i32
    %c0_i32_0 = arith.constant 0 : i32
    %c0_i32_1 = arith.constant 0 : i32
    return %c0_i32, %c0_i32_0 : i32, i32
  }
  func.func @transform_14(%arg0: i32) -> (i32, i32) {
    %c0_i32 = arith.constant 0 : i32
    %c0_i32_0 = arith.constant 0 : i32
    %c0_i32_1 = arith.constant 0 : i32
    return %c0_i32, %c0_i32_0 : i32, i32
  }
  func.func @transform_15(%arg0: i32) -> (i32, i32) {
    %c0_i32 = arith.constant 0 : i32
    %c0_i32_0 = arith.constant 0 : i32
    %c0_i32_1 = arith.constant 0 : i32
    return %c0_i32, %c0_i32_0 : i32, i32
  }
}

</mosaic_0001>

<bundles_post_ra>
// kernel: rnn_autoencoder_forward.1
= control target key start
LH: loop header
LB: loop body
LE: loop exit
PB: predicated region body
PF: predicated region fallthrough
CT: control target
= control target key end

     0   :  { %20 = vsyncpa [#allocation5], 0  ;;  %s5022_s0 = inlined_call_operand.vmem [shape: f32[64,8], index: 0, kind: input, shape index: {}]   ;;  %s5023_s1 = inlined_call_operand.hbm [shape: f32[8,32], index: 1, kind: input, shape index: {}]   ;;  %s5024_s2 = inlined_call_operand.vmem [shape: f32[32,32], index: 2, kind: input, shape index: {}]   ;;  %s5025_s3 = inlined_call_operand.vmem [shape: f32[1,32], index: 3, kind: input, shape index: {}]   ;;  %s5026_s4 = inlined_call_operand.vmem [shape: f32[32,32], index: 4, kind: input, shape index: {}]   ;;  %s5027_s5 = inlined_call_operand.vmem [shape: f32[32,32], index: 5, kind: input, shape index: {}]   ;;  %s5028_s6 = inlined_call_operand.vmem [shape: f32[1,32], index: 6, kind: input, shape index: {}]   ;;  %s5029_s7 = inlined_call_operand.vmem [shape: f32[32,32], index: 7, kind: input, shape index: {}]   ;;  %s5030_s8 = inlined_call_operand.vmem [shape: f32[32,32], index: 8, kind: input, shape index: {}]   ;;  %s5031_s9 = inlined_call_operand.vmem [shape: f32[1,32], index: 9, kind: input, shape index: {}]   ;;  %s5032_s10 = inlined_call_operand.hbm [shape: f32[32,32], index: 10, kind: input, shape index: {}]   ;;  %s5033_s11 = inlined_call_operand.hbm [shape: f32[32,32], index: 11, kind: input, shape index: {}]   ;;  %s5034_s12 = inlined_call_operand.vmem [shape: f32[1,32], index: 12, kind: input, shape index: {}]   ;;  %s5035_s13 = inlined_call_operand.vmem [shape: f32[32,8], index: 13, kind: input, shape index: {}]   ;;  %s5036_s14 = inlined_call_operand.hbm [shape: f32[1,8], index: 14, kind: input, shape index: {}]   ;;  %s5037_s15 = inlined_call_operand.vmem [shape: f32[64,8], index: 15, kind: output, shape index: {}]  }
   0x1   :  { %21 = vsyncpa [#allocation7], 0 }
   0x2   :  { %22 = vsyncpa [#allocation10], 0  ;;  %s4254_s18 = smov [#allocation6]  }
   0x3   :  { %s56_s19 = sshll.u32 %s4254_s18, 4  ;;  %s57_s19 = int_to_ptr.vmem [resolvable:$true] %s56_s19 }
   0x4   :  { %s4176_s20 = scalar_lea.vmem %s57_s19, 512  ;;  %p4181_p1 = scmp.lt.s32.totalorder %s57_s19, %s57_s19 }
   0x5   :  { %p4177_p0 = scmp.ne.s32.totalorder %s57_s19, %s4176_s20  ;;  %p4182_p2 = scmp.lt.s32.totalorder %s4176_s20, %s4176_s20 }
   0x7   :  { %p4183_p3 = por %p4182_p2, %p4181_p1 }
   0x9   :  { %p4184_p4 = pnand %p4183_p3, %p4177_p0 }
   0xb   :  { %4187 = shalt.err (!%p4184_p4)
}
   0xc   :  { %s4255_s21 = smov 128   ;;  %s4256_s22 = smov 8  }
   0xd   :  { %62 = dma.hbm_to_vmem [thread:$0]  %s5032_s10, 512, %s57_s19, [#allocation7], %s4255_s21, %s4255_s21, %s4256_s22  }
   0xe   :  { %s4257_s25 = smov [#allocation4]   ;;  %s4258_s27 = smov [#allocation8]  }
   0xf   :  { %s31_s26 = sshll.u32 %s4257_s25, 4  ;;  %s68_s28 = sshll.u32 %s4258_s27, 4  ;;  %s32_s26 = int_to_ptr.vmem [resolvable:$true] %s31_s26  ;;  %s69_s28 = int_to_ptr.vmem [resolvable:$true] %s68_s28 }
  0x10   :  { %s4196_s29 = scalar_lea.vmem %s32_s26, 128  ;;  %p4201_p6 = scmp.lt.s32.totalorder %s32_s26, %s32_s26 }
  0x11   :  { %p4197_p5 = scmp.ne.s32.totalorder %s32_s26, %s4196_s29  ;;  %p4202_p7 = scmp.lt.s32.totalorder %s4196_s29, %s4196_s29 }
  0x13   :  { %p4203_p8 = por %p4202_p7, %p4201_p6 }
  0x15   :  { %p4204_p9 = pnand %p4203_p8, %p4197_p5 }
  0x17   :  { %4207 = shalt.err (!%p4204_p9)
}
  0x18   :  { %34 = dma.hbm_to_vmem [thread:$0]  %s5023_s1, 128, %s32_s26, [#allocation5]  }
  0x19   :  { %s4216_s17 = scalar_lea.vmem %s69_s28, 512  ;;  %p4221_p11 = scmp.lt.s32.totalorder %s69_s28, %s69_s28 }
  0x1a   :  { %p4217_p10 = scmp.ne.s32.totalorder %s69_s28, %s4216_s17  ;;  %p4222_p12 = scmp.lt.s32.totalorder %s4216_s17, %s4216_s17 }
  0x1c   :  { %p4223_p13 = por %p4222_p12, %p4221_p11 }
  0x1e   :  { %p4224_p0 = pnand %p4223_p13, %p4217_p10 }
  0x20   :  { %4227 = shalt.err (!%p4224_p0)
}
  0x21   :  { %74 = dma.hbm_to_vmem [thread:$0]  %s5033_s11, 512, %s69_s28, [#allocation7], %s4255_s21, %s4255_s21, %s4256_s22  }
  0x22   :  { %s4259_s19 = smov [#allocation9]  }
  0x23   :  { %s85_s20 = sshll.u32 %s4259_s19, 4  ;;  %s86_s20 = int_to_ptr.vmem [resolvable:$true] %s85_s20 }
  0x24   :  { %s4236_s23 = scalar_lea.vmem %s86_s20, 16  ;;  %s4240_s24 = scalar_lea.vmem %s86_s20, 32 }
  0x25   :  { %p4237_p1 = scmp.ne.s32.totalorder %s86_s20, %s4236_s23  ;;  %p4241_p2 = scmp.lt.s32.totalorder %s86_s20, %s86_s20 }
  0x26   :  { %p4242_p3 = scmp.lt.s32.totalorder %s4240_s24, %s4236_s23 }
  0x28   :  { %p4243_p4 = por %p4242_p3, %p4241_p2 }
  0x2a   :  { %p4244_p5 = pnand %p4243_p4, %p4237_p1 }
  0x2c   :  { %4247 = shalt.err (!%p4244_p5)
}
  0x2d   :  { %88 = dma.hbm_to_vmem [thread:$0]  %s5036_s14, 16, %s86_s20, [#allocation10]  }
  0x2e   :  { %4248 = dma.done.wait [#allocation5], 128  }
  0x2f   :  { %4249 = vsyncadd [#allocation5], 4294967168 }
  0x30   :  { %4250 = dma.done.wait [#allocation7], 1024  }
  0x31   :  { %4251 = vsyncadd [#allocation7], 4294966272 }
  0x32   :  { %4252 = dma.done.wait [#allocation10], 16  }
  0x33   :  { %4253 = vsyncadd [#allocation10], 4294967280  ;;  %vm121_vm0 = vcmask 64512   ;;  %v101_v0 = vld [vmem:[#allocation4] sm:$0xff]  ;;  %v108_v2 = vld [vmem:[%s5022_s0 + $0x8] sm:$0xff]  ;;  %v4260_v7 = vmov 0.0  }
  0x34   :  { %v107_v1 = vld [vmem:[%s5022_s0] sm:$0xff]  ;;  %3648 = vmatprep.subr.mxu0 %v101_v0  ;;  %4094 = vmatprep.subr.mxu1 %v101_v0  ;;  %v112_v4 = vld [vmem:[%s5022_s0 + $0x28] sm:$0xff]  ;;  %v4371_v5 = vld [vmem:[%s5024_s2 + $0x18] sm:$0xff]  ;;  %vm4261_vm1 = vmmov 0   ;;  %vm251_vm2 = vcmask 261120  }
  0x35   :  { %3650 = vmatprep.mubr.msk.f32.mxu0 %vm121_vm0, %v107_v1  ;;  %v111_v3 = vld [vmem:[%s5022_s0 + $0x20] sm:$0xff]  ;;  %3649 = vmatpush3.msra.mxu0 %v101_v0  ;;  %v113_v6 = vld [vmem:[%s5022_s0 + $0x30] sm:$0xff]  ;;  %v114_v9 = vld [vmem:[%s5022_s0 + $0x38] sm:$0xff] }
  0x36   :  { %3651 = vmatmul.mubr.msk.f32.vlgmr.msra.gmra.mxu0 %vm121_vm0, %v108_v2  ;;  %4095 = vmatpush3.msra.mxu1 %v101_v0  ;;  %v4382_v8 = vld [vmem:[%s5024_s2 + $0x10] sm:$0xff]  ;;  %v4394_v10 = vld [vmem:[%s5024_s2 + $0x8] sm:$0xff]  ;;  %v4404_v11 = vld [vmem:[%s5024_s2] sm:$0xff] }
  0x37   :  { %3656 = vmatprep.mubr.msk.f32.mxu1 %vm121_vm0, %v111_v3  ;;  %3662 = vmatprep.subr.mxu1 %v4260_v7  ;;  %v4432_v12 = vld [vmem:[%s5025_s3] ss:$0 sm:$0xff]  ;;  %v109_v30 = vld [vmem:[%s5022_s0 + $0x10] sm:$0xff]  ;;  %v110_v31 = vld [vmem:[%s5022_s0 + $0x18] sm:$0xff] }
  0x38   :  { %3657 = vmatmul.mubr.msk.f32.vlgmr.msra.gmra.mxu1 %vm121_vm0, %v112_v4  ;;  %3684 = vmatprep.subr.mxu0 %v4260_v7  ;;  %v879_v56 = vld [vmem:[%s5026_s4 + $0x18] sm:$0xff]  ;;  %v878_v62 = vld [vmem:[%s5026_s4 + $0x10] sm:$0xff]  ;;  %v877_v0 = vld [vmem:[%s5026_s4 + $0x8] sm:$0xff] }
  0x39   :  { %3663 = vmatpush3.msra.mxu1 %v4371_v5  ;;  %3659 = vmatprep.mubr.msk.f32.mxu1 %vm121_vm0, %v113_v6  ;;  %v876_v1 = vld [vmem:[%s5026_s4] sm:$0xff] }
  0x3a   :  { %3664 = vmatprep.subr.mxu1 %v4260_v7  ;;  %3685 = vmatpush3.msra.mxu0 %v4371_v5 }
  0x3b   :  { %3665 = vmatpush3.msra.mxu1 %v4382_v8  ;;  %3686 = vmatprep.subr.mxu0 %v4260_v7 }
  0x3c   :  { %3660 = vmatmul.mubr.msk.f32.gmra.mxu1 %vm121_vm0, %v114_v9  ;;  %3666 = vmatprep.subr.mxu1 %v4260_v7  ;;  %v4549_v9 = vld [vmem:[%s5027_s5 + $0x10] sm:$0xff] }
  0x3d   :  { %3667 = vmatpush3.msra.mxu1 %v4394_v10  ;;  %3670 = vmatprep.mubr.msk.f32.mxu1 %vm4261_vm1, %v4260_v7 }
  0x3e   :  { %3668 = vmatprep.subr.mxu1 %v4260_v7  ;;  %3687 = vmatpush3.msra.mxu0 %v4382_v8 }
  0x3f   :  { %3669 = vmatpush3.msra.mxu1 %v4404_v11  ;;  %3688 = vmatprep.subr.mxu0 %v4260_v7 }
  0x40   :  { %3671 = vmatmul.mubr.f32.vlgmr.msra.gmra.mxu1 %v4260_v7  ;;  %3673 = vmatprep.subr.mxu1 %v4260_v7 }
  0x41   :  { %3674 = vmatpush3.msra.mxu1 %v4371_v5  ;;  %3681 = vmatprep.mubr.msk.f32.mxu1 %vm4261_vm1, %v4260_v7 }
  0x42   :  { %3675 = vmatprep.subr.mxu1 %v4260_v7  ;;  %3689 = vmatpush3.msra.mxu0 %v4394_v10 }
  0x43   :  { %3676 = vmatpush3.msra.mxu1 %v4382_v8  ;;  %3690 = vmatprep.subr.mxu0 %v4260_v7 }
  0x44   :  { %3677 = vmatprep.subr.mxu1 %v4260_v7  ;;  %3691 = vmatpush3.msra.mxu0 %v4404_v11 }
  0x45   :  { %3678 = vmatpush3.msra.mxu1 %v4394_v10  ;;  %3706 = vmatprep.subr.mxu0 %v4260_v7 }
  0x46   :  { %3679 = vmatprep.subr.mxu1 %v4260_v7  ;;  %3653 = vmatprep.mubr.msk.f32.mxu0 %vm121_vm0, %v109_v30 }
  0x47   :  { %3680 = vmatpush3.msra.mxu1 %v4404_v11  ;;  %3654 = vmatmul.mubr.msk.f32.gmra.mxu0 %vm121_vm0, %v110_v31 }
  0x48   :  { %3695 = vmatprep.subr.mxu1 %v4260_v7  ;;  %3692 = vmatprep.mubr.msk.f32.mxu0 %vm4261_vm1, %v4260_v7 }
  0xf6   :  { %v3652_v13 = vpop.f32.mrf.mxu0 }
  0xf7   :  { %v218_v14 = vadd.f32 %v3652_v13, %v4432_v12 }
  0xf8   :  { %v212_v15 = vpop.f32.mrf.mxu0  ;;  %v3658_v16 = vpop.f32.mrf.mxu1 }
  0xf9   :  { %253 = vst.msk [vmem:[#allocation2 + $0x8] sm:$0xff] %vm251_vm2, %v218_v14  ;;  %v213_v17 = vadd.f32 %v4432_v12, %v212_v15  ;;  %v238_v18 = vadd.f32 %v3658_v16, %v4432_v12  ;;  %v4571_v16 = vld [vmem:[%s5028_s6] ss:$0 sm:$0xff] }
  0xfa   :  { %v232_v19 = vpop.f32.mrf.mxu1 }
  0xfb   :  { %252 = vst.msk [vmem:[#allocation2] sm:$0xff] %vm251_vm2, %v213_v17  ;;  %257 = vst.msk [vmem:[#allocation2 + $0x28] sm:$0xff] %vm251_vm2, %v238_v18  ;;  %v233_v20 = vadd.f32 %v4432_v12, %v232_v19 }
  0xfc   :  { %v3661_v21 = vpop.f32.mrf.mxu1 }
  0xfd   :  { %256 = vst.msk [vmem:[#allocation2 + $0x20] sm:$0xff] %vm251_vm2, %v233_v20  ;;  %v248_v22 = vadd.f32 %v3661_v21, %v4432_v12 }
  0xfe   :  { %v242_v23 = vpop.f32.mrf.mxu1 }
  0xff   :  { %259 = vst.msk [vmem:[#allocation2 + $0x38] sm:$0xff] %vm251_vm2, %v248_v22  ;;  %v243_v24 = vadd.f32 %v4432_v12, %v242_v23 }
 0x100   :  { %v330_v25 = vpop.f32.mrf.mxu1  ;;  %v337_v32 = vld [vmem:[#allocation2 + $0x8] sm:$0xff] }
 0x101   :  { %258 = vst.msk [vmem:[#allocation2 + $0x30] sm:$0xff] %vm251_vm2, %v243_v24 }
 0x102   :  { %v260_v26 = vld [vmem:[#allocation2] sm:$0xff]  ;;  %v3672_v27 = vpop.f32.mrf.mxu1  ;;  %v645_v57 = vld [vmem:[#allocation2 + $0x28] sm:$0xff] }
 0x103   :  { %v334_v28 = vadd.f32 %v330_v25, %v260_v26 }
 0x104   :  { %v568_v51 = vld [vmem:[#allocation2 + $0x20] sm:$0xff] }
 0x105   :  { %4104 = vtanh.f32 %v334_v28 }
 0x106   :  { %v799_v31 = vld [vmem:[#allocation2 + $0x38] sm:$0xff] }
 0x107   :  { %v3655_v37 = vpop.f32.mrf.mxu0 }
 0x108   :  { %v228_v38 = vadd.f32 %v3655_v37, %v4432_v12 }
 0x109   :  { %v222_v39 = vpop.f32.mrf.mxu0 }
 0x10a   :  { %255 = vst.msk [vmem:[#allocation2 + $0x18] sm:$0xff] %vm251_vm2, %v228_v38  ;;  %v223_v40 = vadd.f32 %v4432_v12, %v222_v39  ;;  %v722_v12 = vld [vmem:[#allocation2 + $0x30] sm:$0xff] }
 0x10c   :  { %254 = vst.msk [vmem:[#allocation2 + $0x10] sm:$0xff] %vm251_vm2, %v223_v40 }
 0x111   :  { %v491_v46 = vld [vmem:[#allocation2 + $0x18] sm:$0xff] }
 0x112   :  { %v4105_v29 = vpop.eup %4104 }
 0x113   :  { %336 = vst.msk [vmem:[#allocation3] sm:$0xff] %vm251_vm2, %v4105_v29  ;;  %3682 = vmatmul.mubr.msk.f32.vlgmr.msra.gmra.mxu1 %vm251_vm2, %v4105_v29  ;;  %v414_v41 = vld [vmem:[#allocation2 + $0x10] sm:$0xff] }
 0x114   :  { %3696 = vmatpush3.msra.mxu1 %v4371_v5  ;;  %3703 = vmatprep.mubr.msk.f32.mxu1 %vm4261_vm1, %v4260_v7 }
 0x115   :  { %3697 = vmatprep.subr.mxu1 %v4260_v7 }
 0x116   :  { %3698 = vmatpush3.msra.mxu1 %v4382_v8 }
 0x117   :  { %3699 = vmatprep.subr.mxu1 %v4260_v7 }
 0x118   :  { %3700 = vmatpush3.msra.mxu1 %v4394_v10 }
 0x119   :  { %3701 = vmatprep.subr.mxu1 %v4260_v7 }
 0x11a   :  { %3702 = vmatpush3.msra.mxu1 %v4404_v11  ;;  %v885_v63 = vld [vmem:[#allocation3] sm:$0xff] }
 0x11b   :  { %3717 = vmatprep.subr.mxu1 %v4260_v7 }
 0x1d3   :  { %v407_v33 = vpop.f32.mrf.mxu1 }
 0x1d4   :  { %v411_v34 = vadd.f32 %v407_v33, %v337_v32 }
 0x1d5   :  { %v3683_v35 = vpop.f32.mrf.mxu1 }
 0x1d6   :  { %4106 = vtanh.f32 %v411_v34 }
 0x1e3   :  { %v4107_v36 = vpop.eup %4106 }
 0x1e4   :  { %413 = vst.msk [vmem:[#allocation3 + $0x8] sm:$0xff] %vm251_vm2, %v4107_v36  ;;  %3693 = vmatmul.mubr.msk.f32.vlgmr.msra.gmra.mxu0 %vm251_vm2, %v4107_v36 }
 0x1e5   :  { %3707 = vmatpush3.msra.mxu0 %v4371_v5  ;;  %3714 = vmatprep.mubr.msk.f32.mxu0 %vm4261_vm1, %v4260_v7 }
 0x1e6   :  { %3708 = vmatprep.subr.mxu0 %v4260_v7 }
 0x1e7   :  { %3709 = vmatpush3.msra.mxu0 %v4382_v8 }
 0x1e8   :  { %3710 = vmatprep.subr.mxu0 %v4260_v7 }
 0x1e9   :  { %3711 = vmatpush3.msra.mxu0 %v4394_v10 }
 0x1ea   :  { %3712 = vmatprep.subr.mxu0 %v4260_v7 }
 0x1eb   :  { %3713 = vmatpush3.msra.mxu0 %v4404_v11  ;;  %v886_v2 = vld [vmem:[#allocation3 + $0x8] sm:$0xff] }
 0x1ec   :  { %3728 = vmatprep.subr.mxu0 %v4260_v7 }
 0x2a4   :  { %v484_v42 = vpop.f32.mrf.mxu0 }
 0x2a5   :  { %v488_v43 = vadd.f32 %v484_v42, %v414_v41 }
 0x2a6   :  { %v3694_v44 = vpop.f32.mrf.mxu0 }
 0x2a7   :  { %4108 = vtanh.f32 %v488_v43 }
 0x2b4   :  { %v4109_v45 = vpop.eup %4108 }
 0x2b5   :  { %490 = vst.msk [vmem:[#allocation3 + $0x10] sm:$0xff] %vm251_vm2, %v4109_v45  ;;  %3704 = vmatmul.mubr.msk.f32.vlgmr.msra.gmra.mxu1 %vm251_vm2, %v4109_v45 }
 0x2b6   :  { %3718 = vmatpush3.msra.mxu1 %v4371_v5  ;;  %3725 = vmatprep.mubr.msk.f32.mxu1 %vm4261_vm1, %v4260_v7 }
 0x2b7   :  { %3719 = vmatprep.subr.mxu1 %v4260_v7 }
 0x2b8   :  { %3720 = vmatpush3.msra.mxu1 %v4382_v8 }
 0x2b9   :  { %3721 = vmatprep.subr.mxu1 %v4260_v7 }
 0x2ba   :  { %3722 = vmatpush3.msra.mxu1 %v4394_v10 }
 0x2bb   :  { %3723 = vmatprep.subr.mxu1 %v4260_v7 }
 0x2bc   :  { %3724 = vmatpush3.msra.mxu1 %v4404_v11  ;;  %v887_v3 = vld [vmem:[#allocation3 + $0x10] sm:$0xff] }
 0x2bd   :  { %3739 = vmatprep.subr.mxu1 %v4260_v7 }
 0x375   :  { %v561_v47 = vpop.f32.mrf.mxu1 }
 0x376   :  { %v565_v48 = vadd.f32 %v561_v47, %v491_v46 }
 0x377   :  { %v3705_v49 = vpop.f32.mrf.mxu1 }
 0x378   :  { %4110 = vtanh.f32 %v565_v48 }
 0x385   :  { %v4111_v50 = vpop.eup %4110 }
 0x386   :  { %567 = vst.msk [vmem:[#allocation3 + $0x18] sm:$0xff] %vm251_vm2, %v4111_v50  ;;  %3715 = vmatmul.mubr.msk.f32.vlgmr.msra.gmra.mxu0 %vm251_vm2, %v4111_v50 }
 0x387   :  { %3729 = vmatpush3.msra.mxu0 %v4371_v5  ;;  %3736 = vmatprep.mubr.msk.f32.mxu0 %vm4261_vm1, %v4260_v7 }
 0x388   :  { %3730 = vmatprep.subr.mxu0 %v4260_v7 }
 0x389   :  { %3731 = vmatpush3.msra.mxu0 %v4382_v8 }
 0x38a   :  { %3732 = vmatprep.subr.mxu0 %v4260_v7 }
 0x38b   :  { %3733 = vmatpush3.msra.mxu0 %v4394_v10 }
 0x38c   :  { %3734 = vmatprep.subr.mxu0 %v4260_v7 }
 0x38d   :  { %3735 = vmatpush3.msra.mxu0 %v4404_v11  ;;  %v888_v4 = vld [vmem:[#allocation3 + $0x18] sm:$0xff] }
 0x38e   :  { %3750 = vmatprep.subr.mxu0 %v879_v56 }
 0x446   :  { %v638_v52 = vpop.f32.mrf.mxu0 }
 0x447   :  { %v642_v53 = vadd.f32 %v638_v52, %v568_v51 }
 0x448   :  { %v3716_v54 = vpop.f32.mrf.mxu0 }
 0x449   :  { %4112 = vtanh.f32 %v642_v53 }
 0x456   :  { %v4113_v55 = vpop.eup %4112 }
 0x457   :  { %644 = vst.msk [vmem:[#allocation3 + $0x20] sm:$0xff] %vm251_vm2, %v4113_v55  ;;  %3726 = vmatmul.mubr.msk.f32.vlgmr.msra.gmra.mxu1 %vm251_vm2, %v4113_v55 }
 0x458   :  { %3740 = vmatpush3.msra.mxu1 %v4371_v5  ;;  %3747 = vmatprep.mubr.msk.f32.mxu1 %vm4261_vm1, %v4260_v7 }
 0x459   :  { %3741 = vmatprep.subr.mxu1 %v4260_v7 }
 0x45a   :  { %3742 = vmatpush3.msra.mxu1 %v4382_v8  ;;  %v4543_v8 = vld [vmem:[%s5027_s5 + $0x18] sm:$0xff] }
 0x45b   :  { %3743 = vmatprep.subr.mxu1 %v4260_v7 }
 0x45c   :  { %3744 = vmatpush3.msra.mxu1 %v4394_v10  ;;  %v4556_v10 = vld [vmem:[%s5027_s5 + $0x8] sm:$0xff] }
 0x45d   :  { %3745 = vmatprep.subr.mxu1 %v4260_v7 }
 0x45e   :  { %3746 = vmatpush3.msra.mxu1 %v4404_v11  ;;  %v889_v5 = vld [vmem:[#allocation3 + $0x20] sm:$0xff] }
 0x45f   :  { %3770 = vmatprep.subr.mxu1 %v4260_v7  ;;  %v4563_v11 = vld [vmem:[%s5027_s5] sm:$0xff] }
 0x517   :  { %v715_v58 = vpop.f32.mrf.mxu1 }
 0x518   :  { %v719_v59 = vadd.f32 %v715_v58, %v645_v57 }
 0x519   :  { %v3727_v60 = vpop.f32.mrf.mxu1 }
 0x51a   :  { %4114 = vtanh.f32 %v719_v59 }
 0x527   :  { %v4115_v61 = vpop.eup %4114 }
 0x528   :  { %721 = vst.msk [vmem:[#allocation3 + $0x28] sm:$0xff] %vm251_vm2, %v4115_v61  ;;  %3737 = vmatmul.mubr.msk.f32.vlgmr.msra.gmra.mxu0 %vm251_vm2, %v4115_v61 }
 0x529   :  { %3751 = vmatpush3.msra.mxu0 %v879_v56  ;;  %3758 = vmatprep.mubr.msk.f32.mxu0 %vm251_vm2, %v885_v63 }
 0x52a   :  { %3752 = vmatprep.subr.mxu0 %v878_v62 }
 0x52b   :  { %3753 = vmatpush3.msra.mxu0 %v878_v62 }
 0x52c   :  { %3754 = vmatprep.subr.mxu0 %v877_v0 }
 0x52d   :  { %3755 = vmatpush3.msra.mxu0 %v877_v0 }
 0x52e   :  { %3756 = vmatprep.subr.mxu0 %v876_v1 }
 0x52f   :  { %3757 = vmatpush3.msra.mxu0 %v876_v1  ;;  %v890_v6 = vld [vmem:[#allocation3 + $0x28] sm:$0xff] }
 0x530   :  { %3759 = vmatmul.mubr.msk.f32.vlgmr.msra.gmra.mxu0 %vm251_vm2, %v886_v2  ;;  %3792 = vmatprep.subr.mxu0 %v4260_v7  ;;  %v1652_v2 = vld [vmem:[%s5029_s7 + $0x18] sm:$0xff] }
 0x531   :  { %3761 = vmatprep.mubr.msk.f32.mxu0 %vm251_vm2, %v887_v3  ;;  %3793 = vmatpush3.msra.mxu0 %v4543_v8 }
 0x532   :  { %3794 = vmatprep.subr.mxu0 %v4260_v7 }
 0x533   :  { %3795 = vmatpush3.msra.mxu0 %v4549_v9 }
 0x534   :  { %3762 = vmatmul.mubr.msk.f32.gmra.mxu0 %vm251_vm2, %v888_v4  ;;  %3796 = vmatprep.subr.mxu0 %v4260_v7 }
 0x535   :  { %3764 = vmatprep.mubr.msk.f32.mxu0 %vm251_vm2, %v889_v5  ;;  %3797 = vmatpush3.msra.mxu0 %v4556_v10 }
 0x536   :  { %3798 = vmatprep.subr.mxu0 %v4260_v7 }
 0x537   :  { %3799 = vmatpush3.msra.mxu0 %v4563_v11 }
 0x538   :  { %3765 = vmatmul.mubr.msk.f32.gmra.mxu0 %vm251_vm2, %v890_v6  ;;  %3814 = vmatprep.subr.mxu0 %v4260_v7 }
 0x5e8   :  { %v792_v13 = vpop.f32.mrf.mxu0 }
 0x5e9   :  { %v796_v14 = vadd.f32 %v792_v13, %v722_v12  ;;  %v1649_v12 = vld [vmem:[%s5029_s7] sm:$0xff] }
 0x5ea   :  { %v3738_v15 = vpop.f32.mrf.mxu0 }
 0x5eb   :  { %4116 = vtanh.f32 %v796_v14 }
 0x5f0   :  { %v3760_v17 = vpop.f32.mrf.mxu0 }
 0x5f1   :  { %v995_v18 = vadd.f32 %v3760_v17, %v4571_v16 }
 0x5f2   :  { %v989_v19 = vpop.f32.mrf.mxu0 }
 0x5f3   :  { %1029 = vst.msk [vmem:[#allocation2 + $0x8] sm:$0xff] %vm251_vm2, %v995_v18  ;;  %v990_v20 = vadd.f32 %v4571_v16, %v989_v19  ;;  %v4700_v18 = vld [vmem:[%s5030_s8 + $0x18] sm:$0xff]  ;;  %v4706_v19 = vld [vmem:[%s5030_s8 + $0x10] sm:$0xff] }
 0x5f4   :  { %v3763_v21 = vpop.f32.mrf.mxu0 }
 0x5f5   :  { %1028 = vst.msk [vmem:[#allocation2] sm:$0xff] %vm251_vm2, %v990_v20  ;;  %v1005_v22 = vadd.f32 %v3763_v21, %v4571_v16  ;;  %v4713_v20 = vld [vmem:[%s5030_s8 + $0x8] sm:$0xff]  ;;  %v4720_v21 = vld [vmem:[%s5030_s8] sm:$0xff] }
 0x5f6   :  { %v999_v23 = vpop.f32.mrf.mxu0 }
 0x5f7   :  { %1031 = vst.msk [vmem:[#allocation2 + $0x18] sm:$0xff] %vm251_vm2, %v1005_v22  ;;  %v1000_v24 = vadd.f32 %v4571_v16, %v999_v23 }
 0x5f8   :  { %v4117_v25 = vpop.eup %4116  ;;  %v3766_v26 = vpop.f32.mrf.mxu0 }
 0x5f9   :  { %798 = vst.msk [vmem:[#allocation3 + $0x30] sm:$0xff] %vm251_vm2, %v4117_v25  ;;  %1030 = vst.msk [vmem:[#allocation2 + $0x10] sm:$0xff] %vm251_vm2, %v1000_v24  ;;  %v1015_v27 = vadd.f32 %v3766_v26, %v4571_v16  ;;  %3748 = vmatmul.mubr.msk.f32.vlgmr.msra.gmra.mxu1 %vm251_vm2, %v4117_v25  ;;  %v4728_v26 = vld [vmem:[%s5031_s9] ss:$0 sm:$0xff] }
 0x5fa   :  { %v1009_v28 = vpop.f32.mrf.mxu0  ;;  %3771 = vmatpush3.msra.mxu1 %v4543_v8  ;;  %3778 = vmatprep.mubr.msk.f32.mxu1 %vm4261_vm1, %v4260_v7  ;;  %v1110_v42 = vld [vmem:[#allocation2 + $0x8] sm:$0xff] }
 0x5fb   :  { %1033 = vst.msk [vmem:[#allocation2 + $0x28] sm:$0xff] %vm251_vm2, %v1015_v27  ;;  %v1010_v29 = vadd.f32 %v4571_v16, %v1009_v28  ;;  %3772 = vmatprep.subr.mxu1 %v4260_v7 }
 0x5fc   :  { %3773 = vmatpush3.msra.mxu1 %v4549_v9  ;;  %v1036_v35 = vld [vmem:[#allocation2] sm:$0xff] }
 0x5fd   :  { %1032 = vst.msk [vmem:[#allocation2 + $0x20] sm:$0xff] %vm251_vm2, %v1010_v29  ;;  %3774 = vmatprep.subr.mxu1 %v4260_v7 }
 0x5fe   :  { %3775 = vmatpush3.msra.mxu1 %v4556_v10  ;;  %v1264_v56 = vld [vmem:[#allocation2 + $0x18] sm:$0xff] }
 0x5ff   :  { %3776 = vmatprep.subr.mxu1 %v4260_v7 }
 0x600   :  { %3777 = vmatpush3.msra.mxu1 %v4563_v11  ;;  %v891_v30 = vld [vmem:[#allocation3 + $0x30] sm:$0xff] }
 0x601   :  { %3779 = vmatmul.mubr.f32.vlgmr.msra.gmra.mxu1 %v4260_v7  ;;  %3767 = vmatprep.mubr.msk.f32.mxu0 %vm251_vm2, %v891_v30  ;;  %v1187_v51 = vld [vmem:[#allocation2 + $0x10] sm:$0xff] }
 0x602   :  { %3781 = vmatprep.subr.mxu1 %v4260_v7  ;;  %3789 = vmatprep.mubr.msk.f32.mxu1 %vm4261_vm1, %v4260_v7  ;;  %v1418_v3 = vld [vmem:[#allocation2 + $0x28] sm:$0xff] }
 0x603   :  { %3782 = vmatpush3.msra.mxu1 %v4543_v8 }
 0x604   :  { %3783 = vmatprep.subr.mxu1 %v4260_v7  ;;  %v1341_v61 = vld [vmem:[#allocation2 + $0x20] sm:$0xff] }
 0x605   :  { %3784 = vmatpush3.msra.mxu1 %v4549_v9 }
 0x606   :  { %3785 = vmatprep.subr.mxu1 %v4260_v7 }
 0x607   :  { %3786 = vmatpush3.msra.mxu1 %v4556_v10 }
 0x608   :  { %3787 = vmatprep.subr.mxu1 %v4260_v7 }
 0x609   :  { %3788 = vmatpush3.msra.mxu1 %v4563_v11 }
 0x60a   :  { %3803 = vmatprep.subr.mxu1 %v4260_v7 }
 0x6b9   :  { %v869_v32 = vpop.f32.mrf.mxu1 }
 0x6ba   :  { %v873_v33 = vadd.f32 %v869_v32, %v799_v31 }
 0x6bb   :  { %v3749_v34 = vpop.f32.mrf.mxu1 }
 0x6bc   :  { %4118 = vtanh.f32 %v873_v33 }
 0x6c1   :  { %v1103_v36 = vpop.f32.mrf.mxu1 }
 0x6c2   :  { %v1107_v37 = vadd.f32 %v1103_v36, %v1036_v35 }
 0x6c3   :  { %v3780_v38 = vpop.f32.mrf.mxu1 }
 0x6c4   :  { %4120 = vtanh.f32 %v1107_v37 }
 0x6c9   :  { %v4119_v39 = vpop.eup %4118 }
 0x6ca   :  { %875 = vst.msk [vmem:[#allocation3 + $0x38] sm:$0xff] %vm251_vm2, %v4119_v39 }
 0x6d1   :  { %v4121_v40 = vpop.eup %4120  ;;  %v892_v41 = vld [vmem:[#allocation3 + $0x38] sm:$0xff] }
 0x6d2   :  { %1109 = vst.msk [vmem:[#allocation3] sm:$0xff] %vm251_vm2, %v4121_v40  ;;  %3790 = vmatmul.mubr.msk.f32.vlgmr.msra.gmra.mxu1 %vm251_vm2, %v4121_v40  ;;  %3768 = vmatmul.mubr.msk.f32.gmra.mxu0 %vm251_vm2, %v892_v41 }
 0x6d3   :  { %3800 = vmatprep.mubr.msk.f32.mxu0 %vm4261_vm1, %v4260_v7  ;;  %3804 = vmatpush3.msra.mxu1 %v4543_v8 }
 0x6d4   :  { %3805 = vmatprep.subr.mxu1 %v4260_v7  ;;  %3811 = vmatprep.mubr.msk.f32.mxu1 %vm4261_vm1, %v4260_v7 }
 0x6d5   :  { %3806 = vmatpush3.msra.mxu1 %v4549_v9 }
 0x6d6   :  { %3807 = vmatprep.subr.mxu1 %v4260_v7 }
 0x6d7   :  { %3808 = vmatpush3.msra.mxu1 %v4556_v10 }
 0x6d8   :  { %3809 = vmatprep.subr.mxu1 %v4260_v7 }
 0x6d9   :  { %3810 = vmatpush3.msra.mxu1 %v4563_v11 }
 0x6da   :  { %3825 = vmatprep.subr.mxu1 %v4260_v7 }
 0x792   :  { %v1180_v43 = vpop.f32.mrf.mxu1  ;;  %v3769_v44 = vpop.f32.mrf.mxu0 }
 0x793   :  { %v1184_v45 = vadd.f32 %v1180_v43, %v1110_v42  ;;  %v1025_v46 = vadd.f32 %v3769_v44, %v4571_v16 }
 0x794   :  { %v3791_v47 = vpop.f32.mrf.mxu1  ;;  %v1019_v48 = vpop.f32.mrf.mxu0 }
 0x795   :  { %4122 = vtanh.f32 %v1184_v45  ;;  %1035 = vst.msk [vmem:[#allocation2 + $0x38] sm:$0xff] %vm251_vm2, %v1025_v46  ;;  %v1020_v49 = vadd.f32 %v4571_v16, %v1019_v48 }
 0x797   :  { %1034 = vst.msk [vmem:[#allocation2 + $0x30] sm:$0xff] %vm251_vm2, %v1020_v49 }
 0x79c   :  { %v1572_v41 = vld [vmem:[#allocation2 + $0x38] sm:$0xff] }
 0x79e   :  { %v1495_v22 = vld [vmem:[#allocation2 + $0x30] sm:$0xff] }
 0x7a2   :  { %v4123_v50 = vpop.eup %4122 }
 0x7a3   :  { %1186 = vst.msk [vmem:[#allocation3 + $0x8] sm:$0xff] %vm251_vm2, %v4123_v50  ;;  %3801 = vmatmul.mubr.msk.f32.vlgmr.msra.gmra.mxu0 %vm251_vm2, %v4123_v50 }
 0x7a4   :  { %3815 = vmatpush3.msra.mxu0 %v4543_v8  ;;  %3822 = vmatprep.mubr.msk.f32.mxu0 %vm4261_vm1, %v4260_v7 }
 0x7a5   :  { %3816 = vmatprep.subr.mxu0 %v4260_v7 }
 0x7a6   :  { %3817 = vmatpush3.msra.mxu0 %v4549_v9 }
 0x7a7   :  { %3818 = vmatprep.subr.mxu0 %v4260_v7 }
 0x7a8   :  { %3819 = vmatpush3.msra.mxu0 %v4556_v10 }
 0x7a9   :  { %3820 = vmatprep.subr.mxu0 %v4260_v7 }
 0x7aa   :  { %3821 = vmatpush3.msra.mxu0 %v4563_v11  ;;  %v1659_v13 = vld [vmem:[#allocation3 + $0x8] sm:$0xff] }
 0x7ab   :  { %3836 = vmatprep.subr.mxu0 %v4260_v7 }
 0x863   :  { %v1257_v52 = vpop.f32.mrf.mxu0 }
 0x864   :  { %v1261_v53 = vadd.f32 %v1257_v52, %v1187_v51 }
 0x865   :  { %v3802_v54 = vpop.f32.mrf.mxu0 }
 0x866   :  { %4124 = vtanh.f32 %v1261_v53 }
 0x873   :  { %v4125_v55 = vpop.eup %4124 }
 0x874   :  { %1263 = vst.msk [vmem:[#allocation3 + $0x10] sm:$0xff] %vm251_vm2, %v4125_v55  ;;  %3812 = vmatmul.mubr.msk.f32.vlgmr.msra.gmra.mxu1 %vm251_vm2, %v4125_v55 }
 0x875   :  { %3826 = vmatpush3.msra.mxu1 %v4543_v8  ;;  %3833 = vmatprep.mubr.msk.f32.mxu1 %vm4261_vm1, %v4260_v7 }
 0x876   :  { %3827 = vmatprep.subr.mxu1 %v4260_v7 }
 0x877   :  { %3828 = vmatpush3.msra.mxu1 %v4549_v9 }
 0x878   :  { %3829 = vmatprep.subr.mxu1 %v4260_v7 }
 0x879   :  { %3830 = vmatpush3.msra.mxu1 %v4556_v10 }
 0x87a   :  { %3831 = vmatprep.subr.mxu1 %v4260_v7 }
 0x87b   :  { %3832 = vmatpush3.msra.mxu1 %v4563_v11  ;;  %v1660_v14 = vld [vmem:[#allocation3 + $0x10] sm:$0xff] }
 0x87c   :  { %3847 = vmatprep.subr.mxu1 %v4260_v7 }
 0x934   :  { %v1334_v57 = vpop.f32.mrf.mxu1 }
 0x935   :  { %v1338_v58 = vadd.f32 %v1334_v57, %v1264_v56 }
 0x936   :  { %v3813_v59 = vpop.f32.mrf.mxu1 }
 0x937   :  { %4126 = vtanh.f32 %v1338_v58 }
 0x944   :  { %v4127_v60 = vpop.eup %4126 }
 0x945   :  { %1340 = vst.msk [vmem:[#allocation3 + $0x18] sm:$0xff] %vm251_vm2, %v4127_v60  ;;  %3823 = vmatmul.mubr.msk.f32.vlgmr.msra.gmra.mxu0 %vm251_vm2, %v4127_v60 }
 0x946   :  { %3837 = vmatpush3.msra.mxu0 %v4543_v8  ;;  %3844 = vmatprep.mubr.msk.f32.mxu0 %vm4261_vm1, %v4260_v7 }
 0x947   :  { %3838 = vmatprep.subr.mxu0 %v4260_v7 }
 0x948   :  { %3839 = vmatpush3.msra.mxu0 %v4549_v9 }
 0x949   :  { %3840 = vmatprep.subr.mxu0 %v4260_v7 }
 0x94a   :  { %3841 = vmatpush3.msra.mxu0 %v4556_v10 }
 0x94b   :  { %3842 = vmatprep.subr.mxu0 %v4260_v7 }
 0x94c   :  { %3843 = vmatpush3.msra.mxu0 %v4563_v11  ;;  %v1661_v15 = vld [vmem:[#allocation3 + $0x18] sm:$0xff] }
 0x94d   :  { %3858 = vmatprep.subr.mxu0 %v1652_v2 }
 0xa05   :  { %v1411_v62 = vpop.f32.mrf.mxu0 }
 0xa06   :  { %v1415_v63 = vadd.f32 %v1411_v62, %v1341_v61 }
 0xa07   :  { %v3824_v0 = vpop.f32.mrf.mxu0 }
 0xa08   :  { %4128 = vtanh.f32 %v1415_v63 }
 0xa15   :  { %v4129_v1 = vpop.eup %4128 }
 0xa16   :  { %1417 = vst.msk [vmem:[#allocation3 + $0x20] sm:$0xff] %vm251_vm2, %v4129_v1  ;;  %3834 = vmatmul.mubr.msk.f32.vlgmr.msra.gmra.mxu1 %vm251_vm2, %v4129_v1 }
 0xa17   :  { %3848 = vmatpush3.msra.mxu1 %v4543_v8  ;;  %3855 = vmatprep.mubr.msk.f32.mxu1 %vm4261_vm1, %v4260_v7 }
 0xa18   :  { %3849 = vmatprep.subr.mxu1 %v4260_v7 }
 0xa19   :  { %3850 = vmatpush3.msra.mxu1 %v4549_v9  ;;  %v1651_v9 = vld [vmem:[%s5029_s7 + $0x10] sm:$0xff] }
 0xa1a   :  { %3851 = vmatprep.subr.mxu1 %v4260_v7 }
 0xa1b   :  { %3852 = vmatpush3.msra.mxu1 %v4556_v10  ;;  %v1658_v10 = vld [vmem:[#allocation3] sm:$0xff] }
 0xa1c   :  { %3853 = vmatprep.subr.mxu1 %v4260_v7 }
 0xa1d   :  { %3854 = vmatpush3.msra.mxu1 %v4563_v11  ;;  %v1650_v11 = vld [vmem:[%s5029_s7 + $0x8] sm:$0xff]  ;;  %v1662_v16 = vld [vmem:[#allocation3 + $0x20] sm:$0xff] }
 0xa1e   :  { %3878 = vmatprep.subr.mxu1 %v4260_v7 }
 0xad6   :  { %v1488_v4 = vpop.f32.mrf.mxu1 }
 0xad7   :  { %v1492_v5 = vadd.f32 %v1488_v4, %v1418_v3 }
 0xad8   :  { %v3835_v6 = vpop.f32.mrf.mxu1 }
 0xad9   :  { %4130 = vtanh.f32 %v1492_v5 }
 0xae6   :  { %v4131_v8 = vpop.eup %4130 }
 0xae7   :  { %1494 = vst.msk [vmem:[#allocation3 + $0x28] sm:$0xff] %vm251_vm2, %v4131_v8  ;;  %3845 = vmatmul.mubr.msk.f32.vlgmr.msra.gmra.mxu0 %vm251_vm2, %v4131_v8 }
 0xae8   :  { %3859 = vmatpush3.msra.mxu0 %v1652_v2  ;;  %3866 = vmatprep.mubr.msk.f32.mxu0 %vm251_vm2, %v1658_v10 }
 0xae9   :  { %3860 = vmatprep.subr.mxu0 %v1651_v9 }
 0xaea   :  { %3861 = vmatpush3.msra.mxu0 %v1651_v9 }
 0xaeb   :  { %3862 = vmatprep.subr.mxu0 %v1650_v11 }
 0xaec   :  { %3863 = vmatpush3.msra.mxu0 %v1650_v11 }
 0xaed   :  { %3864 = vmatprep.subr.mxu0 %v1649_v12 }
 0xaee   :  { %3865 = vmatpush3.msra.mxu0 %v1649_v12  ;;  %v1663_v17 = vld [vmem:[#allocation3 + $0x28] sm:$0xff] }
 0xaef   :  { %3867 = vmatmul.mubr.msk.f32.vlgmr.msra.gmra.mxu0 %vm251_vm2, %v1659_v13  ;;  %3900 = vmatprep.subr.mxu0 %v4260_v7  ;;  %v2425_v13 = vld [vmem:[#allocation6 + $0x18] sm:$0xff] }
 0xaf0   :  { %3869 = vmatprep.mubr.msk.f32.mxu0 %vm251_vm2, %v1660_v14  ;;  %3901 = vmatpush3.msra.mxu0 %v4700_v18 }
 0xaf1   :  { %3902 = vmatprep.subr.mxu0 %v4260_v7 }
 0xaf2   :  { %3903 = vmatpush3.msra.mxu0 %v4706_v19 }
 0xaf3   :  { %3870 = vmatmul.mubr.msk.f32.gmra.mxu0 %vm251_vm2, %v1661_v15  ;;  %3904 = vmatprep.subr.mxu0 %v4260_v7 }
 0xaf4   :  { %3872 = vmatprep.mubr.msk.f32.mxu0 %vm251_vm2, %v1662_v16  ;;  %3905 = vmatpush3.msra.mxu0 %v4713_v20 }
 0xaf5   :  { %3906 = vmatprep.subr.mxu0 %v4260_v7 }
 0xaf6   :  { %3907 = vmatpush3.msra.mxu0 %v4720_v21 }
 0xaf7   :  { %3873 = vmatmul.mubr.msk.f32.gmra.mxu0 %vm251_vm2, %v1663_v17  ;;  %3922 = vmatprep.subr.mxu0 %v4260_v7 }
 0xba7   :  { %v1565_v23 = vpop.f32.mrf.mxu0 }
 0xba8   :  { %v1569_v24 = vadd.f32 %v1565_v23, %v1495_v22  ;;  %v2424_v22 = vld [vmem:[#allocation6 + $0x10] sm:$0xff] }
 0xba9   :  { %v3846_v25 = vpop.f32.mrf.mxu0 }
 0xbaa   :  { %4132 = vtanh.f32 %v1569_v24 }
 0xbaf   :  { %v3868_v27 = vpop.f32.mrf.mxu0 }
 0xbb0   :  { %v1768_v28 = vadd.f32 %v3868_v27, %v4728_v26 }
 0xbb1   :  { %v1762_v29 = vpop.f32.mrf.mxu0 }
 0xbb2   :  { %1802 = vst.msk [vmem:[#allocation2 + $0x8] sm:$0xff] %vm251_vm2, %v1768_v28  ;;  %v1763_v30 = vadd.f32 %v4728_v26, %v1762_v29  ;;  %v4842_v28 = vld [vmem:[#allocation8 + $0x18] sm:$0xff]  ;;  %v4845_v29 = vld [vmem:[#allocation8 + $0x10] sm:$0xff] }
 0xbb3   :  { %v3871_v31 = vpop.f32.mrf.mxu0 }
 0xbb4   :  { %1801 = vst.msk [vmem:[#allocation2] sm:$0xff] %vm251_vm2, %v1763_v30  ;;  %v1778_v32 = vadd.f32 %v3871_v31, %v4728_v26  ;;  %v4849_v30 = vld [vmem:[#allocation8 + $0x8] sm:$0xff]  ;;  %v4853_v31 = vld [vmem:[#allocation8] sm:$0xff] }
 0xbb5   :  { %v1772_v33 = vpop.f32.mrf.mxu0 }
 0xbb6   :  { %1804 = vst.msk [vmem:[#allocation2 + $0x18] sm:$0xff] %vm251_vm2, %v1778_v32  ;;  %v1773_v34 = vadd.f32 %v4728_v26, %v1772_v33 }
 0xbb7   :  { %v4133_v35 = vpop.eup %4132  ;;  %v3874_v36 = vpop.f32.mrf.mxu0 }
 0xbb8   :  { %1571 = vst.msk [vmem:[#allocation3 + $0x30] sm:$0xff] %vm251_vm2, %v4133_v35  ;;  %1803 = vst.msk [vmem:[#allocation2 + $0x10] sm:$0xff] %vm251_vm2, %v1773_v34  ;;  %v1788_v37 = vadd.f32 %v3874_v36, %v4728_v26  ;;  %3856 = vmatmul.mubr.msk.f32.vlgmr.msra.gmra.mxu1 %vm251_vm2, %v4133_v35  ;;  %v4861_v36 = vld [vmem:[%s5034_s12] ss:$0 sm:$0xff] }
 0xbb9   :  { %v1782_v38 = vpop.f32.mrf.mxu0  ;;  %3879 = vmatpush3.msra.mxu1 %v4700_v18  ;;  %3886 = vmatprep.mubr.msk.f32.mxu1 %vm4261_vm1, %v4260_v7  ;;  %v1883_v52 = vld [vmem:[#allocation2 + $0x8] sm:$0xff] }
 0xbba   :  { %1806 = vst.msk [vmem:[#allocation2 + $0x28] sm:$0xff] %vm251_vm2, %v1788_v37  ;;  %v1783_v39 = vadd.f32 %v4728_v26, %v1782_v38  ;;  %3880 = vmatprep.subr.mxu1 %v4260_v7 }
 0xbbb   :  { %3881 = vmatpush3.msra.mxu1 %v4706_v19  ;;  %v1809_v45 = vld [vmem:[#allocation2] sm:$0xff] }
 0xbbc   :  { %1805 = vst.msk [vmem:[#allocation2 + $0x20] sm:$0xff] %vm251_vm2, %v1783_v39  ;;  %3882 = vmatprep.subr.mxu1 %v4260_v7 }
 0xbbd   :  { %3883 = vmatpush3.msra.mxu1 %v4713_v20  ;;  %v2037_v2 = vld [vmem:[#allocation2 + $0x18] sm:$0xff] }
 0xbbe   :  { %3884 = vmatprep.subr.mxu1 %v4260_v7 }
 0xbbf   :  { %3885 = vmatpush3.msra.mxu1 %v4720_v21  ;;  %v1664_v40 = vld [vmem:[#allocation3 + $0x30] sm:$0xff] }
 0xbc0   :  { %3887 = vmatmul.mubr.f32.vlgmr.msra.gmra.mxu1 %v4260_v7  ;;  %3875 = vmatprep.mubr.msk.f32.mxu0 %vm251_vm2, %v1664_v40  ;;  %v1960_v61 = vld [vmem:[#allocation2 + $0x10] sm:$0xff] }
 0xbc1   :  { %3889 = vmatprep.subr.mxu1 %v4260_v7  ;;  %3897 = vmatprep.mubr.msk.f32.mxu1 %vm4261_vm1, %v4260_v7  ;;  %v2191_v14 = vld [vmem:[#allocation2 + $0x28] sm:$0xff] }
 0xbc2   :  { %3890 = vmatpush3.msra.mxu1 %v4700_v18 }
 0xbc3   :  { %3891 = vmatprep.subr.mxu1 %v4260_v7  ;;  %v2114_v8 = vld [vmem:[#allocation2 + $0x20] sm:$0xff] }
 0xbc4   :  { %3892 = vmatpush3.msra.mxu1 %v4706_v19 }
 0xbc5   :  { %3893 = vmatprep.subr.mxu1 %v4260_v7 }
 0xbc6   :  { %3894 = vmatpush3.msra.mxu1 %v4713_v20 }
 0xbc7   :  { %3895 = vmatprep.subr.mxu1 %v4260_v7 }
 0xbc8   :  { %3896 = vmatpush3.msra.mxu1 %v4720_v21 }
 0xbc9   :  { %3911 = vmatprep.subr.mxu1 %v4260_v7 }
 0xc78   :  { %v1642_v42 = vpop.f32.mrf.mxu1 }
 0xc79   :  { %v1646_v43 = vadd.f32 %v1642_v42, %v1572_v41 }
 0xc7a   :  { %v3857_v44 = vpop.f32.mrf.mxu1 }
 0xc7b   :  { %4134 = vtanh.f32 %v1646_v43 }
 0xc80   :  { %v1876_v46 = vpop.f32.mrf.mxu1 }
 0xc81   :  { %v1880_v47 = vadd.f32 %v1876_v46, %v1809_v45 }
 0xc82   :  { %v3888_v48 = vpop.f32.mrf.mxu1 }
 0xc83   :  { %4136 = vtanh.f32 %v1880_v47 }
 0xc88   :  { %v4135_v49 = vpop.eup %4134 }
 0xc89   :  { %1648 = vst.msk [vmem:[#allocation3 + $0x38] sm:$0xff] %vm251_vm2, %v4135_v49 }
 0xc90   :  { %v4137_v50 = vpop.eup %4136  ;;  %v1665_v51 = vld [vmem:[#allocation3 + $0x38] sm:$0xff] }
 0xc91   :  { %1882 = vst.msk [vmem:[#allocation3] sm:$0xff] %vm251_vm2, %v4137_v50  ;;  %3898 = vmatmul.mubr.msk.f32.vlgmr.msra.gmra.mxu1 %vm251_vm2, %v4137_v50  ;;  %3876 = vmatmul.mubr.msk.f32.gmra.mxu0 %vm251_vm2, %v1665_v51 }
 0xc92   :  { %3908 = vmatprep.mubr.msk.f32.mxu0 %vm4261_vm1, %v4260_v7  ;;  %3912 = vmatpush3.msra.mxu1 %v4700_v18 }
 0xc93   :  { %3913 = vmatprep.subr.mxu1 %v4260_v7  ;;  %3919 = vmatprep.mubr.msk.f32.mxu1 %vm4261_vm1, %v4260_v7 }
 0xc94   :  { %3914 = vmatpush3.msra.mxu1 %v4706_v19 }
 0xc95   :  { %3915 = vmatprep.subr.mxu1 %v4260_v7 }
 0xc96   :  { %3916 = vmatpush3.msra.mxu1 %v4713_v20 }
 0xc97   :  { %3917 = vmatprep.subr.mxu1 %v4260_v7 }
 0xc98   :  { %3918 = vmatpush3.msra.mxu1 %v4720_v21 }
 0xc99   :  { %3933 = vmatprep.subr.mxu1 %v4260_v7 }
 0xd51   :  { %v1953_v53 = vpop.f32.mrf.mxu1  ;;  %v3877_v54 = vpop.f32.mrf.mxu0 }
 0xd52   :  { %v1957_v55 = vadd.f32 %v1953_v53, %v1883_v52  ;;  %v1798_v56 = vadd.f32 %v3877_v54, %v4728_v26 }
 0xd53   :  { %v3899_v57 = vpop.f32.mrf.mxu1  ;;  %v1792_v58 = vpop.f32.mrf.mxu0 }
 0xd54   :  { %4138 = vtanh.f32 %v1957_v55  ;;  %1808 = vst.msk [vmem:[#allocation2 + $0x38] sm:$0xff] %vm251_vm2, %v1798_v56  ;;  %v1793_v59 = vadd.f32 %v4728_v26, %v1792_v58 }
 0xd56   :  { %1807 = vst.msk [vmem:[#allocation2 + $0x30] sm:$0xff] %vm251_vm2, %v1793_v59 }
 0xd5b   :  { %v2345_v51 = vld [vmem:[#allocation2 + $0x38] sm:$0xff] }
 0xd5d   :  { %v2268_v32 = vld [vmem:[#allocation2 + $0x30] sm:$0xff] }
 0xd61   :  { %v4139_v60 = vpop.eup %4138 }
 0xd62   :  { %1959 = vst.msk [vmem:[#allocation3 + $0x8] sm:$0xff] %vm251_vm2, %v4139_v60  ;;  %3909 = vmatmul.mubr.msk.f32.vlgmr.msra.gmra.mxu0 %vm251_vm2, %v4139_v60 }
 0xd63   :  { %3923 = vmatpush3.msra.mxu0 %v4700_v18  ;;  %3930 = vmatprep.mubr.msk.f32.mxu0 %vm4261_vm1, %v4260_v7 }
 0xd64   :  { %3924 = vmatprep.subr.mxu0 %v4260_v7 }
 0xd65   :  { %3925 = vmatpush3.msra.mxu0 %v4706_v19 }
 0xd66   :  { %3926 = vmatprep.subr.mxu0 %v4260_v7 }
 0xd67   :  { %3927 = vmatpush3.msra.mxu0 %v4713_v20 }
 0xd68   :  { %3928 = vmatprep.subr.mxu0 %v4260_v7 }
 0xd69   :  { %3929 = vmatpush3.msra.mxu0 %v4720_v21  ;;  %v2432_v23 = vld [vmem:[#allocation3 + $0x8] sm:$0xff] }
 0xd6a   :  { %3944 = vmatprep.subr.mxu0 %v4260_v7 }
 0xe22   :  { %v2030_v62 = vpop.f32.mrf.mxu0 }
 0xe23   :  { %v2034_v63 = vadd.f32 %v2030_v62, %v1960_v61 }
 0xe24   :  { %v3910_v0 = vpop.f32.mrf.mxu0 }
 0xe25   :  { %4140 = vtanh.f32 %v2034_v63 }
 0xe32   :  { %v4141_v1 = vpop.eup %4140 }
 0xe33   :  { %2036 = vst.msk [vmem:[#allocation3 + $0x10] sm:$0xff] %vm251_vm2, %v4141_v1  ;;  %3920 = vmatmul.mubr.msk.f32.vlgmr.msra.gmra.mxu1 %vm251_vm2, %v4141_v1 }
 0xe34   :  { %3934 = vmatpush3.msra.mxu1 %v4700_v18  ;;  %3941 = vmatprep.mubr.msk.f32.mxu1 %vm4261_vm1, %v4260_v7 }
 0xe35   :  { %3935 = vmatprep.subr.mxu1 %v4260_v7 }
 0xe36   :  { %3936 = vmatpush3.msra.mxu1 %v4706_v19 }
 0xe37   :  { %3937 = vmatprep.subr.mxu1 %v4260_v7 }
 0xe38   :  { %3938 = vmatpush3.msra.mxu1 %v4713_v20 }
 0xe39   :  { %3939 = vmatprep.subr.mxu1 %v4260_v7 }
 0xe3a   :  { %3940 = vmatpush3.msra.mxu1 %v4720_v21  ;;  %v2433_v24 = vld [vmem:[#allocation3 + $0x10] sm:$0xff] }
 0xe3b   :  { %3955 = vmatprep.subr.mxu1 %v4260_v7 }
 0xef3   :  { %v2107_v3 = vpop.f32.mrf.mxu1 }
 0xef4   :  { %v2111_v4 = vadd.f32 %v2107_v3, %v2037_v2 }
 0xef5   :  { %v3921_v5 = vpop.f32.mrf.mxu1 }
 0xef6   :  { %4142 = vtanh.f32 %v2111_v4 }
 0xf03   :  { %v4143_v6 = vpop.eup %4142 }
 0xf04   :  { %2113 = vst.msk [vmem:[#allocation3 + $0x18] sm:$0xff] %vm251_vm2, %v4143_v6  ;;  %3931 = vmatmul.mubr.msk.f32.vlgmr.msra.gmra.mxu0 %vm251_vm2, %v4143_v6 }
 0xf05   :  { %3945 = vmatpush3.msra.mxu0 %v4700_v18  ;;  %3952 = vmatprep.mubr.msk.f32.mxu0 %vm4261_vm1, %v4260_v7 }
 0xf06   :  { %3946 = vmatprep.subr.mxu0 %v4260_v7 }
 0xf07   :  { %3947 = vmatpush3.msra.mxu0 %v4706_v19 }
 0xf08   :  { %3948 = vmatprep.subr.mxu0 %v4260_v7 }
 0xf09   :  { %3949 = vmatpush3.msra.mxu0 %v4713_v20 }
 0xf0a   :  { %3950 = vmatprep.subr.mxu0 %v4260_v7 }
 0xf0b   :  { %3951 = vmatpush3.msra.mxu0 %v4720_v21  ;;  %v2434_v25 = vld [vmem:[#allocation3 + $0x18] sm:$0xff] }
 0xf0c   :  { %3966 = vmatprep.subr.mxu0 %v2425_v13 }
 0xfc4   :  { %v2184_v9 = vpop.f32.mrf.mxu0 }
 0xfc5   :  { %v2188_v10 = vadd.f32 %v2184_v9, %v2114_v8 }
 0xfc6   :  { %v3932_v11 = vpop.f32.mrf.mxu0 }
 0xfc7   :  { %4144 = vtanh.f32 %v2188_v10 }
 0xfd4   :  { %v4145_v12 = vpop.eup %4144 }
 0xfd5   :  { %2190 = vst.msk [vmem:[#allocation3 + $0x20] sm:$0xff] %vm251_vm2, %v4145_v12  ;;  %3942 = vmatmul.mubr.msk.f32.vlgmr.msra.gmra.mxu1 %vm251_vm2, %v4145_v12 }
 0xfd6   :  { %3956 = vmatpush3.msra.mxu1 %v4700_v18  ;;  %3963 = vmatprep.mubr.msk.f32.mxu1 %vm4261_vm1, %v4260_v7 }
 0xfd7   :  { %3957 = vmatprep.subr.mxu1 %v4260_v7 }
 0xfd8   :  { %3958 = vmatpush3.msra.mxu1 %v4706_v19  ;;  %v2431_v19 = vld [vmem:[#allocation3] sm:$0xff] }
 0xfd9   :  { %3959 = vmatprep.subr.mxu1 %v4260_v7 }
 0xfda   :  { %3960 = vmatpush3.msra.mxu1 %v4713_v20  ;;  %v2423_v20 = vld [vmem:[#allocation6 + $0x8] sm:$0xff] }
 0xfdb   :  { %3961 = vmatprep.subr.mxu1 %v4260_v7 }
 0xfdc   :  { %3962 = vmatpush3.msra.mxu1 %v4720_v21  ;;  %v2422_v21 = vld [vmem:[#allocation6] sm:$0xff]  ;;  %v2435_v26 = vld [vmem:[#allocation3 + $0x20] sm:$0xff] }
 0xfdd   :  { %3986 = vmatprep.subr.mxu1 %v4260_v7 }
0x1095   :  { %v2261_v15 = vpop.f32.mrf.mxu1 }
0x1096   :  { %v2265_v16 = vadd.f32 %v2261_v15, %v2191_v14 }
0x1097   :  { %v3943_v17 = vpop.f32.mrf.mxu1 }
0x1098   :  { %4146 = vtanh.f32 %v2265_v16 }
0x10a5   :  { %v4147_v18 = vpop.eup %4146 }
0x10a6   :  { %2267 = vst.msk [vmem:[#allocation3 + $0x28] sm:$0xff] %vm251_vm2, %v4147_v18  ;;  %3953 = vmatmul.mubr.msk.f32.vlgmr.msra.gmra.mxu0 %vm251_vm2, %v4147_v18 }
0x10a7   :  { %3967 = vmatpush3.msra.mxu0 %v2425_v13  ;;  %3974 = vmatprep.mubr.msk.f32.mxu0 %vm251_vm2, %v2431_v19 }
0x10a8   :  { %3968 = vmatprep.subr.mxu0 %v2424_v22 }
0x10a9   :  { %3969 = vmatpush3.msra.mxu0 %v2424_v22 }
0x10aa   :  { %3970 = vmatprep.subr.mxu0 %v2423_v20 }
0x10ab   :  { %3971 = vmatpush3.msra.mxu0 %v2423_v20 }
0x10ac   :  { %3972 = vmatprep.subr.mxu0 %v2422_v21 }
0x10ad   :  { %3973 = vmatpush3.msra.mxu0 %v2422_v21  ;;  %v2436_v27 = vld [vmem:[#allocation3 + $0x28] sm:$0xff] }
0x10ae   :  { %3975 = vmatmul.mubr.msk.f32.vlgmr.msra.gmra.mxu0 %vm251_vm2, %v2432_v23  ;;  %4008 = vmatprep.subr.mxu0 %v4260_v7  ;;  %v3206_v23 = vld [vmem:[%s5035_s13 + $0x18] sm:$0xff] }
0x10af   :  { %3977 = vmatprep.mubr.msk.f32.mxu0 %vm251_vm2, %v2433_v24  ;;  %4009 = vmatpush3.msra.mxu0 %v4842_v28 }
0x10b0   :  { %4010 = vmatprep.subr.mxu0 %v4260_v7 }
0x10b1   :  { %4011 = vmatpush3.msra.mxu0 %v4845_v29 }
0x10b2   :  { %3978 = vmatmul.mubr.msk.f32.gmra.mxu0 %vm251_vm2, %v2434_v25  ;;  %4012 = vmatprep.subr.mxu0 %v4260_v7 }
0x10b3   :  { %3980 = vmatprep.mubr.msk.f32.mxu0 %vm251_vm2, %v2435_v26  ;;  %4013 = vmatpush3.msra.mxu0 %v4849_v30 }
0x10b4   :  { %4014 = vmatprep.subr.mxu0 %v4260_v7 }
0x10b5   :  { %4015 = vmatpush3.msra.mxu0 %v4853_v31 }
0x10b6   :  { %3981 = vmatmul.mubr.msk.f32.gmra.mxu0 %vm251_vm2, %v2436_v27  ;;  %4030 = vmatprep.subr.mxu0 %v4260_v7 }
0x1166   :  { %v2338_v33 = vpop.f32.mrf.mxu0 }
0x1167   :  { %v2342_v34 = vadd.f32 %v2338_v33, %v2268_v32 }
0x1168   :  { %v3954_v35 = vpop.f32.mrf.mxu0 }
0x1169   :  { %4148 = vtanh.f32 %v2342_v34 }
0x116e   :  { %v3976_v37 = vpop.f32.mrf.mxu0 }
0x116f   :  { %v2541_v38 = vadd.f32 %v3976_v37, %v4861_v36 }
0x1170   :  { %v2535_v39 = vpop.f32.mrf.mxu0 }
0x1171   :  { %2575 = vst.msk [vmem:[#allocation2 + $0x8] sm:$0xff] %vm251_vm2, %v2541_v38  ;;  %v2536_v40 = vadd.f32 %v4861_v36, %v2535_v39 }
0x1172   :  { %v3979_v41 = vpop.f32.mrf.mxu0 }
0x1173   :  { %2574 = vst.msk [vmem:[#allocation2] sm:$0xff] %vm251_vm2, %v2536_v40  ;;  %v2551_v42 = vadd.f32 %v3979_v41, %v4861_v36  ;;  %v3422_v41 = vld [vmem:[#allocation9] ss:$0 sm:$0xff] }
0x1174   :  { %v2545_v43 = vpop.f32.mrf.mxu0 }
0x1175   :  { %2577 = vst.msk [vmem:[#allocation2 + $0x18] sm:$0xff] %vm251_vm2, %v2551_v42  ;;  %v2546_v44 = vadd.f32 %v4861_v36, %v2545_v43 }
0x1176   :  { %v4149_v45 = vpop.eup %4148  ;;  %v3982_v46 = vpop.f32.mrf.mxu0 }
0x1177   :  { %2344 = vst.msk [vmem:[#allocation3 + $0x30] sm:$0xff] %vm251_vm2, %v4149_v45  ;;  %2576 = vst.msk [vmem:[#allocation2 + $0x10] sm:$0xff] %vm251_vm2, %v2546_v44  ;;  %v2561_v47 = vadd.f32 %v3982_v46, %v4861_v36  ;;  %3964 = vmatmul.mubr.msk.f32.vlgmr.msra.gmra.mxu1 %vm251_vm2, %v4149_v45 }
0x1178   :  { %v2555_v48 = vpop.f32.mrf.mxu0  ;;  %3987 = vmatpush3.msra.mxu1 %v4842_v28  ;;  %3994 = vmatprep.mubr.msk.f32.mxu1 %vm4261_vm1, %v4260_v7  ;;  %v2656_v62 = vld [vmem:[#allocation2 + $0x8] sm:$0xff] }
0x1179   :  { %2579 = vst.msk [vmem:[#allocation2 + $0x28] sm:$0xff] %vm251_vm2, %v2561_v47  ;;  %v2556_v49 = vadd.f32 %v4861_v36, %v2555_v48  ;;  %3988 = vmatprep.subr.mxu1 %v4260_v7 }
0x117a   :  { %3989 = vmatpush3.msra.mxu1 %v4845_v29  ;;  %v2582_v55 = vld [vmem:[#allocation2] sm:$0xff] }
0x117b   :  { %2578 = vst.msk [vmem:[#allocation2 + $0x20] sm:$0xff] %vm251_vm2, %v2556_v49  ;;  %3990 = vmatprep.subr.mxu1 %v4260_v7 }
0x117c   :  { %3991 = vmatpush3.msra.mxu1 %v4849_v30  ;;  %v2810_v13 = vld [vmem:[#allocation2 + $0x18] sm:$0xff] }
0x117d   :  { %3992 = vmatprep.subr.mxu1 %v4260_v7 }
0x117e   :  { %3993 = vmatpush3.msra.mxu1 %v4853_v31  ;;  %v2437_v50 = vld [vmem:[#allocation3 + $0x30] sm:$0xff] }
0x117f   :  { %3995 = vmatmul.mubr.f32.vlgmr.msra.gmra.mxu1 %v4260_v7  ;;  %3983 = vmatprep.mubr.msk.f32.mxu0 %vm251_vm2, %v2437_v50  ;;  %v2733_v8 = vld [vmem:[#allocation2 + $0x10] sm:$0xff] }
0x1180   :  { %3997 = vmatprep.subr.mxu1 %v4260_v7  ;;  %4005 = vmatprep.mubr.msk.f32.mxu1 %vm4261_vm1, %v4260_v7  ;;  %v2964_v24 = vld [vmem:[#allocation2 + $0x28] sm:$0xff] }
0x1181   :  { %3998 = vmatpush3.msra.mxu1 %v4842_v28 }
0x1182   :  { %3999 = vmatprep.subr.mxu1 %v4260_v7  ;;  %v2887_v18 = vld [vmem:[#allocation2 + $0x20] sm:$0xff] }
0x1183   :  { %4000 = vmatpush3.msra.mxu1 %v4845_v29 }
0x1184   :  { %4001 = vmatprep.subr.mxu1 %v4260_v7 }
0x1185   :  { %4002 = vmatpush3.msra.mxu1 %v4849_v30 }
0x1186   :  { %4003 = vmatprep.subr.mxu1 %v4260_v7 }
0x1187   :  { %4004 = vmatpush3.msra.mxu1 %v4853_v31 }
0x1188   :  { %4019 = vmatprep.subr.mxu1 %v4260_v7 }
0x1237   :  { %v2415_v52 = vpop.f32.mrf.mxu1 }
0x1238   :  { %v2419_v53 = vadd.f32 %v2415_v52, %v2345_v51 }
0x1239   :  { %v3965_v54 = vpop.f32.mrf.mxu1 }
0x123a   :  { %4150 = vtanh.f32 %v2419_v53 }
0x123f   :  { %v2649_v56 = vpop.f32.mrf.mxu1 }
0x1240   :  { %v2653_v57 = vadd.f32 %v2649_v56, %v2582_v55 }
0x1241   :  { %v3996_v58 = vpop.f32.mrf.mxu1 }
0x1242   :  { %4152 = vtanh.f32 %v2653_v57 }
0x1247   :  { %v4151_v59 = vpop.eup %4150 }
0x1248   :  { %2421 = vst.msk [vmem:[#allocation3 + $0x38] sm:$0xff] %vm251_vm2, %v4151_v59 }
0x124f   :  { %v4153_v60 = vpop.eup %4152  ;;  %v2438_v61 = vld [vmem:[#allocation3 + $0x38] sm:$0xff] }
0x1250   :  { %2655 = vst.msk [vmem:[#allocation3] sm:$0xff] %vm251_vm2, %v4153_v60  ;;  %4006 = vmatmul.mubr.msk.f32.vlgmr.msra.gmra.mxu1 %vm251_vm2, %v4153_v60  ;;  %3984 = vmatmul.mubr.msk.f32.gmra.mxu0 %vm251_vm2, %v2438_v61 }
0x1251   :  { %4016 = vmatprep.mubr.msk.f32.mxu0 %vm4261_vm1, %v4260_v7  ;;  %4020 = vmatpush3.msra.mxu1 %v4842_v28 }
0x1252   :  { %4021 = vmatprep.subr.mxu1 %v4260_v7  ;;  %4027 = vmatprep.mubr.msk.f32.mxu1 %vm4261_vm1, %v4260_v7 }
0x1253   :  { %4022 = vmatpush3.msra.mxu1 %v4845_v29 }
0x1254   :  { %4023 = vmatprep.subr.mxu1 %v4260_v7 }
0x1255   :  { %4024 = vmatpush3.msra.mxu1 %v4849_v30 }
0x1256   :  { %4025 = vmatprep.subr.mxu1 %v4260_v7 }
0x1257   :  { %4026 = vmatpush3.msra.mxu1 %v4853_v31 }
0x1258   :  { %4041 = vmatprep.subr.mxu1 %v4260_v7 }
0x1310   :  { %v2726_v63 = vpop.f32.mrf.mxu1  ;;  %v3985_v0 = vpop.f32.mrf.mxu0 }
0x1311   :  { %v2730_v1 = vadd.f32 %v2726_v63, %v2656_v62  ;;  %v2571_v2 = vadd.f32 %v3985_v0, %v4861_v36 }
0x1312   :  { %v4007_v3 = vpop.f32.mrf.mxu1  ;;  %v2565_v4 = vpop.f32.mrf.mxu0 }
0x1313   :  { %4154 = vtanh.f32 %v2730_v1  ;;  %2581 = vst.msk [vmem:[#allocation2 + $0x38] sm:$0xff] %vm251_vm2, %v2571_v2  ;;  %v2566_v5 = vadd.f32 %v4861_v36, %v2565_v4 }
0x1315   :  { %2580 = vst.msk [vmem:[#allocation2 + $0x30] sm:$0xff] %vm251_vm2, %v2566_v5 }
0x131a   :  { %v3118_v56 = vld [vmem:[#allocation2 + $0x38] sm:$0xff] }
0x131c   :  { %v3041_v37 = vld [vmem:[#allocation2 + $0x30] sm:$0xff] }
0x1320   :  { %v4155_v6 = vpop.eup %4154 }
0x1321   :  { %2732 = vst.msk [vmem:[#allocation3 + $0x8] sm:$0xff] %vm251_vm2, %v4155_v6  ;;  %4017 = vmatmul.mubr.msk.f32.vlgmr.msra.gmra.mxu0 %vm251_vm2, %v4155_v6 }
0x1322   :  { %4031 = vmatpush3.msra.mxu0 %v4842_v28  ;;  %4038 = vmatprep.mubr.msk.f32.mxu0 %vm4261_vm1, %v4260_v7 }
0x1323   :  { %4032 = vmatprep.subr.mxu0 %v4260_v7 }
0x1324   :  { %4033 = vmatpush3.msra.mxu0 %v4845_v29 }
0x1325   :  { %4034 = vmatprep.subr.mxu0 %v4260_v7 }
0x1326   :  { %4035 = vmatpush3.msra.mxu0 %v4849_v30 }
0x1327   :  { %4036 = vmatprep.subr.mxu0 %v4260_v7 }
0x1328   :  { %4037 = vmatpush3.msra.mxu0 %v4853_v31  ;;  %v3196_v32 = vld [vmem:[#allocation3 + $0x8] sm:$0xff] }
0x1329   :  { %4052 = vmatprep.subr.mxu0 %v4260_v7 }
0x13e1   :  { %v2803_v9 = vpop.f32.mrf.mxu0 }
0x13e2   :  { %v2807_v10 = vadd.f32 %v2803_v9, %v2733_v8 }
0x13e3   :  { %v4018_v11 = vpop.f32.mrf.mxu0 }
0x13e4   :  { %4156 = vtanh.f32 %v2807_v10 }
0x13f1   :  { %v4157_v12 = vpop.eup %4156 }
0x13f2   :  { %2809 = vst.msk [vmem:[#allocation3 + $0x10] sm:$0xff] %vm251_vm2, %v4157_v12  ;;  %4028 = vmatmul.mubr.msk.f32.vlgmr.msra.gmra.mxu1 %vm251_vm2, %v4157_v12 }
0x13f3   :  { %4042 = vmatpush3.msra.mxu1 %v4842_v28  ;;  %4049 = vmatprep.mubr.msk.f32.mxu1 %vm4261_vm1, %v4260_v7 }
0x13f4   :  { %4043 = vmatprep.subr.mxu1 %v4260_v7 }
0x13f5   :  { %4044 = vmatpush3.msra.mxu1 %v4845_v29 }
0x13f6   :  { %4045 = vmatprep.subr.mxu1 %v4260_v7 }
0x13f7   :  { %4046 = vmatpush3.msra.mxu1 %v4849_v30 }
0x13f8   :  { %4047 = vmatprep.subr.mxu1 %v4260_v7 }
0x13f9   :  { %4048 = vmatpush3.msra.mxu1 %v4853_v31  ;;  %v3197_v33 = vld [vmem:[#allocation3 + $0x10] sm:$0xff] }
0x13fa   :  { %4063 = vmatprep.subr.mxu1 %v4260_v7 }
0x14b2   :  { %v2880_v14 = vpop.f32.mrf.mxu1 }
0x14b3   :  { %v2884_v15 = vadd.f32 %v2880_v14, %v2810_v13 }
0x14b4   :  { %v4029_v16 = vpop.f32.mrf.mxu1 }
0x14b5   :  { %4158 = vtanh.f32 %v2884_v15 }
0x14c2   :  { %v4159_v17 = vpop.eup %4158 }
0x14c3   :  { %2886 = vst.msk [vmem:[#allocation3 + $0x18] sm:$0xff] %vm251_vm2, %v4159_v17  ;;  %4039 = vmatmul.mubr.msk.f32.vlgmr.msra.gmra.mxu0 %vm251_vm2, %v4159_v17 }
0x14c4   :  { %4053 = vmatpush3.msra.mxu0 %v4842_v28  ;;  %4060 = vmatprep.mubr.msk.f32.mxu0 %vm4261_vm1, %v4260_v7 }
0x14c5   :  { %4054 = vmatprep.subr.mxu0 %v4260_v7 }
0x14c6   :  { %4055 = vmatpush3.msra.mxu0 %v4845_v29 }
0x14c7   :  { %4056 = vmatprep.subr.mxu0 %v4260_v7 }
0x14c8   :  { %4057 = vmatpush3.msra.mxu0 %v4849_v30 }
0x14c9   :  { %4058 = vmatprep.subr.mxu0 %v4260_v7 }
0x14ca   :  { %4059 = vmatpush3.msra.mxu0 %v4853_v31  ;;  %v3198_v34 = vld [vmem:[#allocation3 + $0x18] sm:$0xff] }
0x14cb   :  { %4074 = vmatprep.subr.mxu0 %v3206_v23 }
0x1583   :  { %v2957_v22 = vpop.f32.mrf.mxu0 }
0x1584   :  { %v2961_v19 = vadd.f32 %v2957_v22, %v2887_v18 }
0x1585   :  { %v4040_v20 = vpop.f32.mrf.mxu0 }
0x1586   :  { %4160 = vtanh.f32 %v2961_v19 }
0x1593   :  { %v4161_v21 = vpop.eup %4160 }
0x1594   :  { %2963 = vst.msk [vmem:[#allocation3 + $0x20] sm:$0xff] %vm251_vm2, %v4161_v21  ;;  %4050 = vmatmul.mubr.msk.f32.vlgmr.msra.gmra.mxu1 %vm251_vm2, %v4161_v21 }
0x1595   :  { %4064 = vmatpush3.msra.mxu1 %v4842_v28  ;;  %4071 = vmatprep.mubr.msk.f32.mxu1 %vm4261_vm1, %v4260_v7 }
0x1596   :  { %4065 = vmatprep.subr.mxu1 %v4260_v7 }
0x1597   :  { %4066 = vmatpush3.msra.mxu1 %v4845_v29  ;;  %v3205_v29 = vld [vmem:[%s5035_s13 + $0x10] sm:$0xff] }
0x1598   :  { %4067 = vmatprep.subr.mxu1 %v4260_v7 }
0x1599   :  { %4068 = vmatpush3.msra.mxu1 %v4849_v30  ;;  %v3204_v30 = vld [vmem:[%s5035_s13 + $0x8] sm:$0xff] }
0x159a   :  { %4069 = vmatprep.subr.mxu1 %v4260_v7  ;;  %v3195_v7 = vld [vmem:[#allocation3] sm:$0xff] }
0x159b   :  { %4070 = vmatpush3.msra.mxu1 %v4853_v31  ;;  %v3203_v31 = vld [vmem:[%s5035_s13] sm:$0xff] }
0x159c   :  { %v3199_v35 = vld [vmem:[#allocation3 + $0x20] sm:$0xff] }
0x1654   :  { %v3034_v25 = vpop.f32.mrf.mxu1 }
0x1655   :  { %v3038_v26 = vadd.f32 %v3034_v25, %v2964_v24 }
0x1656   :  { %v4051_v27 = vpop.f32.mrf.mxu1 }
0x1657   :  { %4162 = vtanh.f32 %v3038_v26 }
0x1664   :  { %v4163_v28 = vpop.eup %4162 }
0x1665   :  { %3040 = vst.msk [vmem:[#allocation3 + $0x28] sm:$0xff] %vm251_vm2, %v4163_v28  ;;  %4061 = vmatmul.mubr.msk.f32.vlgmr.msra.gmra.mxu0 %vm251_vm2, %v4163_v28 }
0x1666   :  { %4075 = vmatpush3.msra.mxu0 %v3206_v23  ;;  %4082 = vmatprep.mubr.msk.f32.mxu0 %vm251_vm2, %v3195_v7 }
0x1667   :  { %4076 = vmatprep.subr.mxu0 %v3205_v29 }
0x1668   :  { %4077 = vmatpush3.msra.mxu0 %v3205_v29 }
0x1669   :  { %4078 = vmatprep.subr.mxu0 %v3204_v30 }
0x166a   :  { %4079 = vmatpush3.msra.mxu0 %v3204_v30 }
0x166b   :  { %4080 = vmatprep.subr.mxu0 %v3203_v31 }
0x166c   :  { %4081 = vmatpush3.msra.mxu0 %v3203_v31  ;;  %v3200_v36 = vld [vmem:[#allocation3 + $0x28] sm:$0xff] }
0x166d   :  { %4083 = vmatmul.mubr.msk.f32.vlgmr.msra.gmra.mxu0 %vm251_vm2, %v3196_v32 }
0x166e   :  { %4085 = vmatprep.mubr.msk.f32.mxu0 %vm251_vm2, %v3197_v33 }
0x1671   :  { %4086 = vmatmul.mubr.msk.f32.gmra.mxu0 %vm251_vm2, %v3198_v34 }
0x1672   :  { %4088 = vmatprep.mubr.msk.f32.mxu0 %vm251_vm2, %v3199_v35 }
0x1675   :  { %4089 = vmatmul.mubr.msk.f32.gmra.mxu0 %vm251_vm2, %v3200_v36 }
0x1725   :  { %v3111_v38 = vpop.f32.mrf.mxu0 }
0x1726   :  { %v3115_v39 = vadd.f32 %v3111_v38, %v3041_v37 }
0x1727   :  { %v4062_v40 = vpop.f32.mrf.mxu0 }
0x1728   :  { %4164 = vtanh.f32 %v3115_v39 }
0x172d   :  { %v4084_v42 = vpop.f32.mrf.mxu0 }
0x172e   :  { %v3310_v43 = vadd.f32 %v4084_v42, %v3422_v41 }
0x172f   :  { %v3304_v44 = vpop.f32.mrf.mxu0 }
0x1730   :  { %3344 = vst.msk [vmem:[%s5037_s15 + $0x8] sm:$0xff] %vm121_vm0, %v3310_v43  ;;  %v3305_v45 = vadd.f32 %v3422_v41, %v3304_v44 }
0x1731   :  { %v4087_v46 = vpop.f32.mrf.mxu0 }
0x1732   :  { %3343 = vst.msk [vmem:[%s5037_s15] sm:$0xff] %vm121_vm0, %v3305_v45  ;;  %v3320_v47 = vadd.f32 %v4087_v46, %v3422_v41 }
0x1733   :  { %v3314_v48 = vpop.f32.mrf.mxu0 }
0x1734   :  { %3346 = vst.msk [vmem:[%s5037_s15 + $0x18] sm:$0xff] %vm121_vm0, %v3320_v47  ;;  %v3315_v49 = vadd.f32 %v3422_v41, %v3314_v48 }
0x1735   :  { %v4165_v50 = vpop.eup %4164  ;;  %v4090_v51 = vpop.f32.mrf.mxu0 }
0x1736   :  { %3117 = vst.msk [vmem:[#allocation3 + $0x30] sm:$0xff] %vm251_vm2, %v4165_v50  ;;  %v3330_v52 = vadd.f32 %v4090_v51, %v3422_v41  ;;  %4072 = vmatmul.mubr.msk.f32.vlgmr.msra.gmra.mxu1 %vm251_vm2, %v4165_v50 }
0x1737   :  { %3345 = vst.msk [vmem:[%s5037_s15 + $0x10] sm:$0xff] %vm121_vm0, %v3315_v49  ;;  %v3324_v53 = vpop.f32.mrf.mxu0 }
0x1738   :  { %3348 = vst.msk [vmem:[%s5037_s15 + $0x28] sm:$0xff] %vm121_vm0, %v3330_v52  ;;  %v3325_v54 = vadd.f32 %v3422_v41, %v3324_v53 }
0x173a   :  { %3347 = vst.msk [vmem:[%s5037_s15 + $0x20] sm:$0xff] %vm121_vm0, %v3325_v54 }
0x173d   :  { %v3201_v55 = vld [vmem:[#allocation3 + $0x30] sm:$0xff] }
0x173e   :  { %4091 = vmatprep.mubr.msk.f32.mxu0 %vm251_vm2, %v3201_v55 }
0x17f6   :  { %v3188_v57 = vpop.f32.mrf.mxu1 }
0x17f7   :  { %v3192_v58 = vadd.f32 %v3188_v57, %v3118_v56 }
0x17f8   :  { %v4073_v59 = vpop.f32.mrf.mxu1 }
0x17f9   :  { %4166 = vtanh.f32 %v3192_v58 }
0x1806   :  { %v4167_v60 = vpop.eup %4166 }
0x1807   :  { %3194 = vst.msk [vmem:[#allocation3 + $0x38] sm:$0xff] %vm251_vm2, %v4167_v60 }
0x180e   :  { %v3202_v61 = vld [vmem:[#allocation3 + $0x38] sm:$0xff] }
0x180f   :  { %4092 = vmatmul.mubr.msk.f32.gmra.mxu0 %vm251_vm2, %v3202_v61 }
0x18cf   :  { %v4093_v62 = vpop.f32.mrf.mxu0 }
0x18d0   :  { %v3340_v63 = vadd.f32 %v4093_v62, %v3422_v41 }
0x18d1   :  { %v3334_v0 = vpop.f32.mrf.mxu0 }
0x18d2   :  { %3350 = vst.msk [vmem:[%s5037_s15 + $0x38] sm:$0xff] %vm121_vm0, %v3340_v63  ;;  %v3335_v1 = vadd.f32 %v3422_v41, %v3334_v0 }
0x18d4   :  { %3349 = vst.msk [vmem:[%s5037_s15 + $0x30] sm:$0xff] %vm121_vm0, %v3335_v1 }
0x18d5   :  { %3355 = vsyncpa [#allocation5], 1 }
0x18d6   :  { %3356 = vsyncpa [#allocation7], 1 }
0x18d7   :  { %3357 = vsyncpa [#allocation10], 1 }

</bundles_post_ra>
